<compile_context>
chip_gen: v5e
topology: v5e:2x2
jax: 0.10.0
libtpu: 0.0.40
codegen_flags: <defaults>
</compile_context>

<pallas_src>
import functools

import jax
import jax.numpy as jnp
import numpy as np
from jax import lax
from jax.experimental import pallas as pl
from jax.experimental.pallas import tpu as pltpu


# ------------------------------- helpers ----------------------------------- #

def _round_up(x, m):
    return (x + m - 1) // m * m


def _nbytes(a):
    return int(np.prod(a.shape)) * jnp.dtype(a.dtype).itemsize


def _pick_batch_tile(n, ho, wo):
    """Batch items per grid step: big enough to amortize ~0.35us/step, but keep
    >=2 parallel blocks (v7x dual-TC) and 8-aligned block rows."""
    per_img = ho * wo
    target = max(1, 2048 // per_img)
    tb = 1
    for cand in range(min(n, target), 0, -1):
        if n % cand == 0:
            tb = cand
            break
    if n >= 2 and n // tb < 2:
        for cand in range(tb - 1, 0, -1):
            if n % cand == 0:
                tb = cand
                break
    if (tb * per_img) % 8 != 0 and n // tb != 1:
        tb = n  # block must span the full array if rows aren't 8-aligned
    return tb


# ----------------------------- Pallas kernel -------------------------------- #

def _conv3x3_bn_act_kernel(*refs, n_ph, stride, ho, wo, relu, has_res, has_sc):
    """3x3 conv (9 in-kernel tap dots) + folded BN + optional residual /
    fused 1x1-shortcut conv+BN + optional ReLU.  No K grid axis, no scratch."""
    ph_refs = refs[:n_ph]
    w_ref, s_ref, b_ref = refs[n_ph:n_ph + 3]
    pos = n_ph + 3
    res_ref = None
    if has_res:
        res_ref = refs[pos]
        pos += 1
    sc_refs = None
    if has_sc:
        sc_refs = refs[pos:pos + 4]
        pos += 4
    o_ref = refs[pos]

    tb, _, _, cin = ph_refs[0].shape
    m = tb * ho * wo
    tn = o_ref.shape[1]

    # Accumulate the 9 taps in f32.  Each tap is a unit-stride static window of
    # one padded "phase" tensor already resident in VMEM (no HBM im2col).
    acc = jnp.zeros((m, tn), jnp.float32)
    for ky in range(3):
        for kx in range(3):
            pr = ph_refs[(ky % stride) * stride + (kx % stride)]
            tap = pr[:, pl.ds(ky // stride, ho), pl.ds(kx // stride, wo), :]
            acc = acc + jnp.dot(tap.reshape(m, cin), w_ref[ky * 3 + kx],
                                preferred_element_type=jnp.float32)

    out = acc * s_ref[...] + b_ref[...]            # folded BN, f32 epilogue
    if has_res:                                    # identity shortcut
        out = out + res_ref[...].astype(jnp.float32)
    if has_sc:                                     # option-'B' 1x1 conv + BN
        xsc_ref, wsc_ref, ssc_ref, bsc_ref = sc_refs
        sc = jnp.dot(xsc_ref[...], wsc_ref[...],
                     preferred_element_type=jnp.float32)
        out = out + sc * ssc_ref[...] + bsc_ref[...]
    if relu:
        out = jnp.maximum(out, 0.0)
    o_ref[...] = out.astype(o_ref.dtype)


# ------------------------------ conv wrapper -------------------------------- #

def conv3x3_bn_act(x_nhwc, w_oihw, scale, bias, *, stride, relu,
                   residual=None, sc_operands=None, out_dtype=jnp.bfloat16):
    """3x3/pad=1 conv + folded BN (+ residual | + fused 1x1 shortcut) + ReLU.

    x_nhwc: (N, H, W, Cin).  Returns (N, Ho, Wo, Cout) in out_dtype.
    """
    n, h, wdim, cin = x_nhwc.shape
    cout = w_oihw.shape[0]
    assert w_oihw.shape[2] == 3 and w_oihw.shape[3] == 3
    ho = (h + 2 - 3) // stride + 1
    wo = (wdim + 2 - 3) // stride + 1
    m = n * ho * wo

    # One 1x halo-pad copy; split into stride^2 phases so every in-kernel tap
    # read is an unstrided static window (no strided VMEM loads, no im2col).
    xp = jnp.pad(x_nhwc.astype(jnp.bfloat16), ((0, 0), (1, 1), (1, 1), (0, 0)))
    phases = [xp[:, a::stride, b::stride, :]
              for a in range(stride) for b in range(stride)]
    n_ph = stride * stride

    # Cout lanes are left un-padded when Cout <= 128 (no inflated writeback).
    tn = min(cout, 128)
    n_pad = _round_up(cout, tn)

    def padn(a):
        if a.shape[-1] == n_pad:
            return a
        pads = [(0, 0)] * (a.ndim - 1) + [(0, n_pad - a.shape[-1])]
        return jnp.pad(a, pads)

    w_arr = padn(jnp.transpose(w_oihw, (2, 3, 1, 0))
                 .reshape(9, cin, cout).astype(jnp.bfloat16))
    s_arr = padn(scale.reshape(1, -1).astype(jnp.float32))
    b_arr = padn(bias.reshape(1, -1).astype(jnp.float32))

    tb = _pick_batch_tile(n, ho, wo)
    grid_b, grid_j = n // tb, n_pad // tn
    m_blk = tb * ho * wo

    args, in_specs = [], []
    for ph in phases:
        hp, wp = ph.shape[1], ph.shape[2]
        args.append(ph)
        in_specs.append(pl.BlockSpec((tb, hp, wp, cin),
                                     lambda bi, j: (bi, 0, 0, 0)))
    args += [w_arr, s_arr, b_arr]
    in_specs += [pl.BlockSpec((9, cin, tn), lambda bi, j: (0, 0, j)),
                 pl.BlockSpec((1, tn), lambda bi, j: (0, j)),
                 pl.BlockSpec((1, tn), lambda bi, j: (0, j))]

    flops = 2 * m * (9 * cin) * n_pad
    extra_bytes = 0

    if residual is not None:
        res = padn(residual.astype(jnp.bfloat16).reshape(m, cout))
        args.append(res)
        in_specs.append(pl.BlockSpec((m_blk, tn), lambda bi, j: (bi, j)))
        extra_bytes += _nbytes(res)
    if sc_operands is not None:
        xsc, wsc, ssc, bsc = sc_operands
        cin_sc = xsc.shape[-1]
        xsc = xsc.astype(jnp.bfloat16).reshape(m, cin_sc)
        wsc = padn(wsc.astype(jnp.bfloat16))
        ssc = padn(ssc.reshape(1, -1).astype(jnp.float32))
        bsc = padn(bsc.reshape(1, -1).astype(jnp.float32))
        args += [xsc, wsc, ssc, bsc]
        in_specs += [pl.BlockSpec((m_blk, cin_sc), lambda bi, j: (bi, 0)),
                     pl.BlockSpec((cin_sc, tn), lambda bi, j: (0, j)),
                     pl.BlockSpec((1, tn), lambda bi, j: (0, j)),
                     pl.BlockSpec((1, tn), lambda bi, j: (0, j))]
        flops += 2 * m * cin_sc * n_pad
        extra_bytes += _nbytes(xsc) + (_nbytes(wsc) + _nbytes(ssc)
                                       + _nbytes(bsc)) * grid_b

    out_bytes = m * n_pad * jnp.dtype(out_dtype).itemsize
    bytes_accessed = (sum(_nbytes(p) for p in phases) * grid_j
                      + (_nbytes(w_arr) + _nbytes(s_arr) + _nbytes(b_arr)) * grid_b
                      + extra_bytes + out_bytes)

    kernel = functools.partial(
        _conv3x3_bn_act_kernel, n_ph=n_ph, stride=stride, ho=ho, wo=wo,
        relu=relu, has_res=residual is not None, has_sc=sc_operands is not None)

    out = pl.pallas_call(
        kernel,
        out_shape=jax.ShapeDtypeStruct((m, n_pad), out_dtype),
        grid_spec=pltpu.PrefetchScalarGridSpec(
            num_scalar_prefetch=0,
            grid=(grid_b, grid_j),
            in_specs=in_specs,
            out_specs=pl.BlockSpec((m_blk, tn), lambda bi, j: (bi, j))),
        compiler_params=pltpu.CompilerParams(
            dimension_semantics=("parallel", "parallel")),
        cost_estimate=pl.CostEstimate(flops=int(flops), transcendentals=0,
                                      bytes_accessed=int(bytes_accessed)),
    )(*args)

    if n_pad != cout:
        out = out[:, :cout]
    return out.reshape(n, ho, wo, cout)


# ------------------------------- JAX glue ----------------------------------- #

def fold_bn(bn_params, eps=1e-5):
    gamma, beta, mean, var = bn_params
    scale = gamma / jnp.sqrt(var + eps)
    bias = beta - mean * scale
    return scale, bias


def init_basic_block(key, in_planes, planes, stride=1):
    ks = jax.random.split(key, 6)

    def bn_init(k, c):
        kg, kb, km, kv = jax.random.split(k, 4)
        gamma = 1.0 + 0.1 * jax.random.normal(kg, (c,), jnp.float32)
        beta = 0.1 * jax.random.normal(kb, (c,), jnp.float32)
        mean = 0.1 * jax.random.normal(km, (c,), jnp.float32)
        var = jnp.abs(jax.random.normal(kv, (c,), jnp.float32)) + 0.5
        return gamma, beta, mean, var

    params = {
        "conv1_w": 0.1 * jax.random.normal(ks[0], (planes, in_planes, 3, 3), jnp.float32),
        "bn1": bn_init(ks[1], planes),
        "conv2_w": 0.1 * jax.random.normal(ks[2], (planes, planes, 3, 3), jnp.float32),
        "bn2": bn_init(ks[3], planes),
    }
    if stride != 1 or in_planes != planes:  # option 'B' shortcut
        params["sc_w"] = 0.1 * jax.random.normal(ks[4], (planes, in_planes, 1, 1), jnp.float32)
        params["sc_bn"] = bn_init(ks[5], planes)
    return params


@functools.partial(jax.jit, static_argnums=(2, 3, 4))
def basic_block_forward(params, x_nchw, in_planes, planes, stride):
    x = jnp.transpose(x_nchw, (0, 2, 3, 1)).astype(jnp.bfloat16)  # NHWC bf16
    n, h, w_sp, _ = x.shape

    # conv1 (3x3, stride) + bn1 + relu  -- one Pallas call, bf16 output.
    s1, b1 = fold_bn(params["bn1"])
    y1 = conv3x3_bn_act(x, params["conv1_w"], s1, b1, stride=stride, relu=True)
    ho, wo = y1.shape[1], y1.shape[2]

    # conv2 (3x3, s=1) + bn2 + shortcut + relu -- fully fused in one Pallas call.
    s2, b2 = fold_bn(params["bn2"])
    if "sc_w" in params:
        wsc = jnp.transpose(params["sc_w"], (2, 3, 1, 0)).reshape(in_planes, planes)
        ssc, bsc = fold_bn(params["sc_bn"])
        xsc = x[:, ::stride, ::stride, :].reshape(n * ho * wo, in_planes)
        out = conv3x3_bn_act(y1, params["conv2_w"], s2, b2, stride=1, relu=True,
                             sc_operands=(xsc, wsc, ssc, bsc))
    else:
        res = x.reshape(n * h * w_sp, planes)
        out = conv3x3_bn_act(y1, params["conv2_w"], s2, b2, stride=1, relu=True,
                             residual=res)

    return jnp.transpose(out, (0, 3, 1, 2)).astype(jnp.float32)  # NCHW


# --------------------------- pure-JAX reference ----------------------------- #

def reference_forward(params, x_nchw, stride, eps=1e-5):
    def conv(x, w, s, pad):
        return lax.conv_general_dilated(
            x, w, window_strides=(s, s), padding=pad,
            dimension_numbers=("NCHW", "OIHW", "NCHW"))

    def bn(x, p):
        gamma, beta, mean, var = (a.reshape(1, -1, 1, 1) for a in p)
        return (x - mean) / jnp.sqrt(var + eps) * gamma + beta

    out = jax.nn.relu(bn(conv(x_nchw, params["conv1_w"], stride, ((1, 1), (1, 1))),
                         params["bn1"]))
    out = bn(conv(out, params["conv2_w"], 1, ((1, 1), (1, 1))), params["bn2"])
    if "sc_w" in params:
        sc = bn(conv(x_nchw, params["sc_w"], stride, ((0, 0), (0, 0))), params["sc_bn"])
    else:
        sc = x_nchw
    return jax.nn.relu(out + sc)


# --------------------------------- main -------------------------------------- #

if __name__ == "__main__":
    key = jax.random.PRNGKey(0)
    kx1, kp1, kx2, kp2 = jax.random.split(key, 4)

    # Case 1: downsampling block with option-'B' 1x1 shortcut (fused into conv2).
    batch, in_planes, planes, spatial, stride = 2, 4, 8, 16, 2
    x1 = jax.random.normal(kx1, (batch, in_planes, spatial, spatial), jnp.float32)
    p1 = init_basic_block(kp1, in_planes, planes, stride)
    out1 = jax.block_until_ready(basic_block_forward(p1, x1, in_planes, planes, stride))
    ref1 = reference_forward(p1, x1, stride)
    # bf16 MXU operands / bf16 output -> relaxed tolerance vs f32 reference.
    np.testing.assert_allclose(np.asarray(out1), np.asarray(ref1), atol=5e-2, rtol=5e-2)

    # Case 2: identity-shortcut block (stride=1, in_planes == planes).
    x2 = jax.random.normal(kx2, (batch, planes, 8, 8), jnp.float32)
    p2 = init_basic_block(kp2, planes, planes, 1)
    out2 = jax.block_until_ready(basic_block_forward(p2, x2, planes, planes, 1))
    ref2 = reference_forward(p2, x2, 1)
    np.testing.assert_allclose(np.asarray(out2), np.asarray(ref2), atol=5e-2, rtol=5e-2)

    print("KERNEL_OK")
</pallas_src>

<mosaic_0001>
module attributes {stable_mosaic.version = 11 : i64} {
  func.func @_conv3x3_bn_act_kernel(%arg0: i32, %arg1: i32, %arg2: memref<1x9x9x4xbf16, #tpu.memory_space<vmem>>, %arg3: memref<1x9x9x4xbf16, #tpu.memory_space<vmem>>, %arg4: memref<1x9x9x4xbf16, #tpu.memory_space<vmem>>, %arg5: memref<1x9x9x4xbf16, #tpu.memory_space<vmem>>, %arg6: memref<9x4x8xbf16, #tpu.memory_space<vmem>>, %arg7: memref<1x8xf32, #tpu.memory_space<vmem>>, %arg8: memref<1x8xf32, #tpu.memory_space<vmem>>, %arg9: memref<64x8xbf16, #tpu.memory_space<vmem>>) attributes {dimension_semantics = [#tpu.dimension_semantics<parallel>, #tpu.dimension_semantics<parallel>], iteration_bounds = array<i64: 2, 1>, scalar_prefetch = 0 : i64, scratch_operands = 0 : i64, tpu.core_type = #tpu.core_type<tc>, window_params = [{transform_indices = @transform_0, window_bounds = array<i64: 1, 9, 9, 4>}, {transform_indices = @transform_1, window_bounds = array<i64: 1, 9, 9, 4>}, {transform_indices = @transform_2, window_bounds = array<i64: 1, 9, 9, 4>}, {transform_indices = @transform_3, window_bounds = array<i64: 1, 9, 9, 4>}, {transform_indices = @transform_4, window_bounds = array<i64: 9, 4, 8>}, {transform_indices = @transform_5, window_bounds = array<i64: 1, 8>}, {transform_indices = @transform_6, window_bounds = array<i64: 1, 8>}, {transform_indices = @transform_7, window_bounds = array<i64: 64, 8>}]} {
    %cst = arith.constant 0.000000e+00 : f32
    %0 = vector.broadcast %cst : f32 to vector<64x8xf32>
    %c0 = arith.constant 0 : index
    %c0_0 = arith.constant 0 : index
    %c0_1 = arith.constant 0 : index
    %c0_2 = arith.constant 0 : index
    %1 = vector.load %arg2[%c0, %c0_0, %c0_1, %c0_2] : memref<1x9x9x4xbf16, #tpu.memory_space<vmem>>, vector<1x8x8x4xbf16>
    %2 = vector.shape_cast %1 : vector<1x8x8x4xbf16> to vector<64x4xbf16>
    %c0_3 = arith.constant 0 : index
    %c0_4 = arith.constant 0 : index
    %c0_5 = arith.constant 0 : index
    %3 = vector.load %arg6[%c0_3, %c0_4, %c0_5] : memref<9x4x8xbf16, #tpu.memory_space<vmem>>, vector<1x4x8xbf16>
    %4 = vector.shape_cast %3 : vector<1x4x8xbf16> to vector<4x8xbf16>
    %cst_6 = arith.constant dense<0.000000e+00> : vector<64x8xf32>
    %5 = tpu.matmul %2, %4, %cst_6 {dimension_numbers = #tpu.dot_dimension_numbers<[1], [0], [0], [1], [0, 0, 1, 1], [], []>} : vector<64x4xbf16>, vector<4x8xbf16>, vector<64x8xf32> -> vector<64x8xf32>
    %6 = arith.addf %0, %5 : vector<64x8xf32>
    %c0_7 = arith.constant 0 : index
    %c0_8 = arith.constant 0 : index
    %c0_9 = arith.constant 0 : index
    %c0_10 = arith.constant 0 : index
    %7 = vector.load %arg3[%c0_7, %c0_8, %c0_9, %c0_10] : memref<1x9x9x4xbf16, #tpu.memory_space<vmem>>, vector<1x8x8x4xbf16>
    %8 = vector.shape_cast %7 : vector<1x8x8x4xbf16> to vector<64x4xbf16>
    %c1 = arith.constant 1 : index
    %c0_11 = arith.constant 0 : index
    %c0_12 = arith.constant 0 : index
    %9 = vector.load %arg6[%c1, %c0_11, %c0_12] : memref<9x4x8xbf16, #tpu.memory_space<vmem>>, vector<1x4x8xbf16>
    %10 = vector.shape_cast %9 : vector<1x4x8xbf16> to vector<4x8xbf16>
    %cst_13 = arith.constant dense<0.000000e+00> : vector<64x8xf32>
    %11 = tpu.matmul %8, %10, %cst_13 {dimension_numbers = #tpu.dot_dimension_numbers<[1], [0], [0], [1], [0, 0, 1, 1], [], []>} : vector<64x4xbf16>, vector<4x8xbf16>, vector<64x8xf32> -> vector<64x8xf32>
    %12 = arith.addf %6, %11 : vector<64x8xf32>
    %c0_14 = arith.constant 0 : index
    %c0_15 = arith.constant 0 : index
    %c1_16 = arith.constant 1 : index
    %c0_17 = arith.constant 0 : index
    %13 = vector.load %arg2[%c0_14, %c0_15, %c1_16, %c0_17] : memref<1x9x9x4xbf16, #tpu.memory_space<vmem>>, vector<1x8x8x4xbf16>
    %14 = vector.shape_cast %13 : vector<1x8x8x4xbf16> to vector<64x4xbf16>
    %c2 = arith.constant 2 : index
    %c0_18 = arith.constant 0 : index
    %c0_19 = arith.constant 0 : index
    %15 = vector.load %arg6[%c2, %c0_18, %c0_19] : memref<9x4x8xbf16, #tpu.memory_space<vmem>>, vector<1x4x8xbf16>
    %16 = vector.shape_cast %15 : vector<1x4x8xbf16> to vector<4x8xbf16>
    %cst_20 = arith.constant dense<0.000000e+00> : vector<64x8xf32>
    %17 = tpu.matmul %14, %16, %cst_20 {dimension_numbers = #tpu.dot_dimension_numbers<[1], [0], [0], [1], [0, 0, 1, 1], [], []>} : vector<64x4xbf16>, vector<4x8xbf16>, vector<64x8xf32> -> vector<64x8xf32>
    %18 = arith.addf %12, %17 : vector<64x8xf32>
    %c0_21 = arith.constant 0 : index
    %c0_22 = arith.constant 0 : index
    %c0_23 = arith.constant 0 : index
    %c0_24 = arith.constant 0 : index
    %19 = vector.load %arg4[%c0_21, %c0_22, %c0_23, %c0_24] : memref<1x9x9x4xbf16, #tpu.memory_space<vmem>>, vector<1x8x8x4xbf16>
    %20 = vector.shape_cast %19 : vector<1x8x8x4xbf16> to vector<64x4xbf16>
    %c3 = arith.constant 3 : index
    %c0_25 = arith.constant 0 : index
    %c0_26 = arith.constant 0 : index
    %21 = vector.load %arg6[%c3, %c0_25, %c0_26] : memref<9x4x8xbf16, #tpu.memory_space<vmem>>, vector<1x4x8xbf16>
    %22 = vector.shape_cast %21 : vector<1x4x8xbf16> to vector<4x8xbf16>
    %cst_27 = arith.constant dense<0.000000e+00> : vector<64x8xf32>
    %23 = tpu.matmul %20, %22, %cst_27 {dimension_numbers = #tpu.dot_dimension_numbers<[1], [0], [0], [1], [0, 0, 1, 1], [], []>} : vector<64x4xbf16>, vector<4x8xbf16>, vector<64x8xf32> -> vector<64x8xf32>
    %24 = arith.addf %18, %23 : vector<64x8xf32>
    %c0_28 = arith.constant 0 : index
    %c0_29 = arith.constant 0 : index
    %c0_30 = arith.constant 0 : index
    %c0_31 = arith.constant 0 : index
    %25 = vector.load %arg5[%c0_28, %c0_29, %c0_30, %c0_31] : memref<1x9x9x4xbf16, #tpu.memory_space<vmem>>, vector<1x8x8x4xbf16>
    %26 = vector.shape_cast %25 : vector<1x8x8x4xbf16> to vector<64x4xbf16>
    %c4 = arith.constant 4 : index
    %c0_32 = arith.constant 0 : index
    %c0_33 = arith.constant 0 : index
    %27 = vector.load %arg6[%c4, %c0_32, %c0_33] : memref<9x4x8xbf16, #tpu.memory_space<vmem>>, vector<1x4x8xbf16>
    %28 = vector.shape_cast %27 : vector<1x4x8xbf16> to vector<4x8xbf16>
    %cst_34 = arith.constant dense<0.000000e+00> : vector<64x8xf32>
    %29 = tpu.matmul %26, %28, %cst_34 {dimension_numbers = #tpu.dot_dimension_numbers<[1], [0], [0], [1], [0, 0, 1, 1], [], []>} : vector<64x4xbf16>, vector<4x8xbf16>, vector<64x8xf32> -> vector<64x8xf32>
    %30 = arith.addf %24, %29 : vector<64x8xf32>
    %c0_35 = arith.constant 0 : index
    %c0_36 = arith.constant 0 : index
    %c1_37 = arith.constant 1 : index
    %c0_38 = arith.constant 0 : index
    %31 = vector.load %arg4[%c0_35, %c0_36, %c1_37, %c0_38] : memref<1x9x9x4xbf16, #tpu.memory_space<vmem>>, vector<1x8x8x4xbf16>
    %32 = vector.shape_cast %31 : vector<1x8x8x4xbf16> to vector<64x4xbf16>
    %c5 = arith.constant 5 : index
    %c0_39 = arith.constant 0 : index
    %c0_40 = arith.constant 0 : index
    %33 = vector.load %arg6[%c5, %c0_39, %c0_40] : memref<9x4x8xbf16, #tpu.memory_space<vmem>>, vector<1x4x8xbf16>
    %34 = vector.shape_cast %33 : vector<1x4x8xbf16> to vector<4x8xbf16>
    %cst_41 = arith.constant dense<0.000000e+00> : vector<64x8xf32>
    %35 = tpu.matmul %32, %34, %cst_41 {dimension_numbers = #tpu.dot_dimension_numbers<[1], [0], [0], [1], [0, 0, 1, 1], [], []>} : vector<64x4xbf16>, vector<4x8xbf16>, vector<64x8xf32> -> vector<64x8xf32>
    %36 = arith.addf %30, %35 : vector<64x8xf32>
    %c0_42 = arith.constant 0 : index
    %c1_43 = arith.constant 1 : index
    %c0_44 = arith.constant 0 : index
    %c0_45 = arith.constant 0 : index
    %37 = vector.load %arg2[%c0_42, %c1_43, %c0_44, %c0_45] : memref<1x9x9x4xbf16, #tpu.memory_space<vmem>>, vector<1x8x8x4xbf16>
    %38 = vector.shape_cast %37 : vector<1x8x8x4xbf16> to vector<64x4xbf16>
    %c6 = arith.constant 6 : index
    %c0_46 = arith.constant 0 : index
    %c0_47 = arith.constant 0 : index
    %39 = vector.load %arg6[%c6, %c0_46, %c0_47] : memref<9x4x8xbf16, #tpu.memory_space<vmem>>, vector<1x4x8xbf16>
    %40 = vector.shape_cast %39 : vector<1x4x8xbf16> to vector<4x8xbf16>
    %cst_48 = arith.constant dense<0.000000e+00> : vector<64x8xf32>
    %41 = tpu.matmul %38, %40, %cst_48 {dimension_numbers = #tpu.dot_dimension_numbers<[1], [0], [0], [1], [0, 0, 1, 1], [], []>} : vector<64x4xbf16>, vector<4x8xbf16>, vector<64x8xf32> -> vector<64x8xf32>
    %42 = arith.addf %36, %41 : vector<64x8xf32>
    %c0_49 = arith.constant 0 : index
    %c1_50 = arith.constant 1 : index
    %c0_51 = arith.constant 0 : index
    %c0_52 = arith.constant 0 : index
    %43 = vector.load %arg3[%c0_49, %c1_50, %c0_51, %c0_52] : memref<1x9x9x4xbf16, #tpu.memory_space<vmem>>, vector<1x8x8x4xbf16>
    %44 = vector.shape_cast %43 : vector<1x8x8x4xbf16> to vector<64x4xbf16>
    %c7 = arith.constant 7 : index
    %c0_53 = arith.constant 0 : index
    %c0_54 = arith.constant 0 : index
    %45 = vector.load %arg6[%c7, %c0_53, %c0_54] : memref<9x4x8xbf16, #tpu.memory_space<vmem>>, vector<1x4x8xbf16>
    %46 = vector.shape_cast %45 : vector<1x4x8xbf16> to vector<4x8xbf16>
    %cst_55 = arith.constant dense<0.000000e+00> : vector<64x8xf32>
    %47 = tpu.matmul %44, %46, %cst_55 {dimension_numbers = #tpu.dot_dimension_numbers<[1], [0], [0], [1], [0, 0, 1, 1], [], []>} : vector<64x4xbf16>, vector<4x8xbf16>, vector<64x8xf32> -> vector<64x8xf32>
    %48 = arith.addf %42, %47 : vector<64x8xf32>
    %c0_56 = arith.constant 0 : index
    %c1_57 = arith.constant 1 : index
    %c1_58 = arith.constant 1 : index
    %c0_59 = arith.constant 0 : index
    %49 = vector.load %arg2[%c0_56, %c1_57, %c1_58, %c0_59] : memref<1x9x9x4xbf16, #tpu.memory_space<vmem>>, vector<1x8x8x4xbf16>
    %50 = vector.shape_cast %49 : vector<1x8x8x4xbf16> to vector<64x4xbf16>
    %c8 = arith.constant 8 : index
    %c0_60 = arith.constant 0 : index
    %c0_61 = arith.constant 0 : index
    %51 = vector.load %arg6[%c8, %c0_60, %c0_61] : memref<9x4x8xbf16, #tpu.memory_space<vmem>>, vector<1x4x8xbf16>
    %52 = vector.shape_cast %51 : vector<1x4x8xbf16> to vector<4x8xbf16>
    %cst_62 = arith.constant dense<0.000000e+00> : vector<64x8xf32>
    %53 = tpu.matmul %50, %52, %cst_62 {dimension_numbers = #tpu.dot_dimension_numbers<[1], [0], [0], [1], [0, 0, 1, 1], [], []>} : vector<64x4xbf16>, vector<4x8xbf16>, vector<64x8xf32> -> vector<64x8xf32>
    %54 = arith.addf %48, %53 : vector<64x8xf32>
    %c0_63 = arith.constant 0 : index
    %c0_64 = arith.constant 0 : index
    %55 = vector.load %arg7[%c0_63, %c0_64] : memref<1x8xf32, #tpu.memory_space<vmem>>, vector<1x8xf32>
    %56 = vector.broadcast %55 : vector<1x8xf32> to vector<64x8xf32>
    %57 = arith.mulf %54, %56 : vector<64x8xf32>
    %c0_65 = arith.constant 0 : index
    %c0_66 = arith.constant 0 : index
    %58 = vector.load %arg8[%c0_65, %c0_66] : memref<1x8xf32, #tpu.memory_space<vmem>>, vector<1x8xf32>
    %59 = vector.broadcast %58 : vector<1x8xf32> to vector<64x8xf32>
    %60 = arith.addf %57, %59 : vector<64x8xf32>
    %cst_67 = arith.constant 0.000000e+00 : f32
    %61 = vector.broadcast %cst_67 : f32 to vector<64x8xf32>
    %62 = arith.maximumf %60, %61 : vector<64x8xf32>
    %63 = arith.truncf %62 : vector<64x8xf32> to vector<64x8xbf16>
    %c0_68 = arith.constant 0 : index
    %c0_69 = arith.constant 0 : index
    %64 = vector.load %arg9[%c0_68, %c0_69] : memref<64x8xbf16, #tpu.memory_space<vmem>>, vector<64x8xbf16>
    tpu.vector_store %arg9[%c0_68, %c0_69], %63 {strides = array<i32>} : memref<64x8xbf16, #tpu.memory_space<vmem>>, vector<64x8xbf16>,
    return
  }
  func.func @transform_0(%arg0: i32, %arg1: i32) -> (i32, i32, i32, i32) {
    %c0_i32 = arith.constant 0 : i32
    %c0_i32_0 = arith.constant 0 : i32
    %c0_i32_1 = arith.constant 0 : i32
    %c0_i32_2 = arith.constant 0 : i32
    return %arg0, %c0_i32, %c0_i32_0, %c0_i32_1 : i32, i32, i32, i32
  }
  func.func @transform_1(%arg0: i32, %arg1: i32) -> (i32, i32, i32, i32) {
    %c0_i32 = arith.constant 0 : i32
    %c0_i32_0 = arith.constant 0 : i32
    %c0_i32_1 = arith.constant 0 : i32
    %c0_i32_2 = arith.constant 0 : i32
    return %arg0, %c0_i32, %c0_i32_0, %c0_i32_1 : i32, i32, i32, i32
  }
  func.func @transform_2(%arg0: i32, %arg1: i32) -> (i32, i32, i32, i32) {
    %c0_i32 = arith.constant 0 : i32
    %c0_i32_0 = arith.constant 0 : i32
    %c0_i32_1 = arith.constant 0 : i32
    %c0_i32_2 = arith.constant 0 : i32
    return %arg0, %c0_i32, %c0_i32_0, %c0_i32_1 : i32, i32, i32, i32
  }
  func.func @transform_3(%arg0: i32, %arg1: i32) -> (i32, i32, i32, i32) {
    %c0_i32 = arith.constant 0 : i32
    %c0_i32_0 = arith.constant 0 : i32
    %c0_i32_1 = arith.constant 0 : i32
    %c0_i32_2 = arith.constant 0 : i32
    return %arg0, %c0_i32, %c0_i32_0, %c0_i32_1 : i32, i32, i32, i32
  }
  func.func @transform_4(%arg0: i32, %arg1: i32) -> (i32, i32, i32) {
    %c0_i32 = arith.constant 0 : i32
    %c0_i32_0 = arith.constant 0 : i32
    %c0_i32_1 = arith.constant 0 : i32
    return %c0_i32, %c0_i32_0, %arg1 : i32, i32, i32
  }
  func.func @transform_5(%arg0: i32, %arg1: i32) -> (i32, i32) {
    %c0_i32 = arith.constant 0 : i32
    %c0_i32_0 = arith.constant 0 : i32
    return %c0_i32, %arg1 : i32, i32
  }
  func.func @transform_6(%arg0: i32, %arg1: i32) -> (i32, i32) {
    %c0_i32 = arith.constant 0 : i32
    %c0_i32_0 = arith.constant 0 : i32
    return %c0_i32, %arg1 : i32, i32
  }
  func.func @transform_7(%arg0: i32, %arg1: i32) -> (i32, i32) {
    %c0_i32 = arith.constant 0 : i32
    return %arg0, %arg1 : i32, i32
  }
}

module attributes {stable_mosaic.version = 11 : i64} {
  func.func @_conv3x3_bn_act_kernel(%arg0: i32, %arg1: i32, %arg2: memref<1x10x10x8xbf16, #tpu.memory_space<vmem>>, %arg3: memref<9x8x8xbf16, #tpu.memory_space<vmem>>, %arg4: memref<1x8xf32, #tpu.memory_space<vmem>>, %arg5: memref<1x8xf32, #tpu.memory_space<vmem>>, %arg6: memref<64x4xbf16, #tpu.memory_space<vmem>>, %arg7: memref<4x8xbf16, #tpu.memory_space<vmem>>, %arg8: memref<1x8xf32, #tpu.memory_space<vmem>>, %arg9: memref<1x8xf32, #tpu.memory_space<vmem>>, %arg10: memref<64x8xbf16, #tpu.memory_space<vmem>>) attributes {dimension_semantics = [#tpu.dimension_semantics<parallel>, #tpu.dimension_semantics<parallel>], iteration_bounds = array<i64: 2, 1>, scalar_prefetch = 0 : i64, scratch_operands = 0 : i64, tpu.core_type = #tpu.core_type<tc>, window_params = [{transform_indices = @transform_0, window_bounds = array<i64: 1, 10, 10, 8>}, {transform_indices = @transform_1, window_bounds = array<i64: 9, 8, 8>}, {transform_indices = @transform_2, window_bounds = array<i64: 1, 8>}, {transform_indices = @transform_3, window_bounds = array<i64: 1, 8>}, {transform_indices = @transform_4, window_bounds = array<i64: 64, 4>}, {transform_indices = @transform_5, window_bounds = array<i64: 4, 8>}, {transform_indices = @transform_6, window_bounds = array<i64: 1, 8>}, {transform_indices = @transform_7, window_bounds = array<i64: 1, 8>}, {transform_indices = @transform_8, window_bounds = array<i64: 64, 8>}]} {
    %cst = arith.constant 0.000000e+00 : f32
    %0 = vector.broadcast %cst : f32 to vector<64x8xf32>
    %c0 = arith.constant 0 : index
    %c0_0 = arith.constant 0 : index
    %c0_1 = arith.constant 0 : index
    %c0_2 = arith.constant 0 : index
    %1 = vector.load %arg2[%c0, %c0_0, %c0_1, %c0_2] : memref<1x10x10x8xbf16, #tpu.memory_space<vmem>>, vector<1x8x8x8xbf16>
    %2 = vector.shape_cast %1 : vector<1x8x8x8xbf16> to vector<64x8xbf16>
    %c0_3 = arith.constant 0 : index
    %c0_4 = arith.constant 0 : index
    %c0_5 = arith.constant 0 : index
    %3 = vector.load %arg3[%c0_3, %c0_4, %c0_5] : memref<9x8x8xbf16, #tpu.memory_space<vmem>>, vector<1x8x8xbf16>
    %4 = vector.shape_cast %3 : vector<1x8x8xbf16> to vector<8x8xbf16>
    %cst_6 = arith.constant dense<0.000000e+00> : vector<64x8xf32>
    %5 = tpu.matmul %2, %4, %cst_6 {dimension_numbers = #tpu.dot_dimension_numbers<[1], [0], [0], [1], [0, 0, 1, 1], [], []>} : vector<64x8xbf16>, vector<8x8xbf16>, vector<64x8xf32> -> vector<64x8xf32>
    %6 = arith.addf %0, %5 : vector<64x8xf32>
    %c0_7 = arith.constant 0 : index
    %c0_8 = arith.constant 0 : index
    %c1 = arith.constant 1 : index
    %c0_9 = arith.constant 0 : index
    %7 = vector.load %arg2[%c0_7, %c0_8, %c1, %c0_9] : memref<1x10x10x8xbf16, #tpu.memory_space<vmem>>, vector<1x8x8x8xbf16>
    %8 = vector.shape_cast %7 : vector<1x8x8x8xbf16> to vector<64x8xbf16>
    %c1_10 = arith.constant 1 : index
    %c0_11 = arith.constant 0 : index
    %c0_12 = arith.constant 0 : index
    %9 = vector.load %arg3[%c1_10, %c0_11, %c0_12] : memref<9x8x8xbf16, #tpu.memory_space<vmem>>, vector<1x8x8xbf16>
    %10 = vector.shape_cast %9 : vector<1x8x8xbf16> to vector<8x8xbf16>
    %cst_13 = arith.constant dense<0.000000e+00> : vector<64x8xf32>
    %11 = tpu.matmul %8, %10, %cst_13 {dimension_numbers = #tpu.dot_dimension_numbers<[1], [0], [0], [1], [0, 0, 1, 1], [], []>} : vector<64x8xbf16>, vector<8x8xbf16>, vector<64x8xf32> -> vector<64x8xf32>
    %12 = arith.addf %6, %11 : vector<64x8xf32>
    %c0_14 = arith.constant 0 : index
    %c0_15 = arith.constant 0 : index
    %c2 = arith.constant 2 : index
    %c0_16 = arith.constant 0 : index
    %13 = vector.load %arg2[%c0_14, %c0_15, %c2, %c0_16] : memref<1x10x10x8xbf16, #tpu.memory_space<vmem>>, vector<1x8x8x8xbf16>
    %14 = vector.shape_cast %13 : vector<1x8x8x8xbf16> to vector<64x8xbf16>
    %c2_17 = arith.constant 2 : index
    %c0_18 = arith.constant 0 : index
    %c0_19 = arith.constant 0 : index
    %15 = vector.load %arg3[%c2_17, %c0_18, %c0_19] : memref<9x8x8xbf16, #tpu.memory_space<vmem>>, vector<1x8x8xbf16>
    %16 = vector.shape_cast %15 : vector<1x8x8xbf16> to vector<8x8xbf16>
    %cst_20 = arith.constant dense<0.000000e+00> : vector<64x8xf32>
    %17 = tpu.matmul %14, %16, %cst_20 {dimension_numbers = #tpu.dot_dimension_numbers<[1], [0], [0], [1], [0, 0, 1, 1], [], []>} : vector<64x8xbf16>, vector<8x8xbf16>, vector<64x8xf32> -> vector<64x8xf32>
    %18 = arith.addf %12, %17 : vector<64x8xf32>
    %c0_21 = arith.constant 0 : index
    %c1_22 = arith.constant 1 : index
    %c0_23 = arith.constant 0 : index
    %c0_24 = arith.constant 0 : index
    %19 = vector.load %arg2[%c0_21, %c1_22, %c0_23, %c0_24] : memref<1x10x10x8xbf16, #tpu.memory_space<vmem>>, vector<1x8x8x8xbf16>
    %20 = vector.shape_cast %19 : vector<1x8x8x8xbf16> to vector<64x8xbf16>
    %c3 = arith.constant 3 : index
    %c0_25 = arith.constant 0 : index
    %c0_26 = arith.constant 0 : index
    %21 = vector.load %arg3[%c3, %c0_25, %c0_26] : memref<9x8x8xbf16, #tpu.memory_space<vmem>>, vector<1x8x8xbf16>
    %22 = vector.shape_cast %21 : vector<1x8x8xbf16> to vector<8x8xbf16>
    %cst_27 = arith.constant dense<0.000000e+00> : vector<64x8xf32>
    %23 = tpu.matmul %20, %22, %cst_27 {dimension_numbers = #tpu.dot_dimension_numbers<[1], [0], [0], [1], [0, 0, 1, 1], [], []>} : vector<64x8xbf16>, vector<8x8xbf16>, vector<64x8xf32> -> vector<64x8xf32>
    %24 = arith.addf %18, %23 : vector<64x8xf32>
    %c0_28 = arith.constant 0 : index
    %c1_29 = arith.constant 1 : index
    %c1_30 = arith.constant 1 : index
    %c0_31 = arith.constant 0 : index
    %25 = vector.load %arg2[%c0_28, %c1_29, %c1_30, %c0_31] : memref<1x10x10x8xbf16, #tpu.memory_space<vmem>>, vector<1x8x8x8xbf16>
    %26 = vector.shape_cast %25 : vector<1x8x8x8xbf16> to vector<64x8xbf16>
    %c4 = arith.constant 4 : index
    %c0_32 = arith.constant 0 : index
    %c0_33 = arith.constant 0 : index
    %27 = vector.load %arg3[%c4, %c0_32, %c0_33] : memref<9x8x8xbf16, #tpu.memory_space<vmem>>, vector<1x8x8xbf16>
    %28 = vector.shape_cast %27 : vector<1x8x8xbf16> to vector<8x8xbf16>
    %cst_34 = arith.constant dense<0.000000e+00> : vector<64x8xf32>
    %29 = tpu.matmul %26, %28, %cst_34 {dimension_numbers = #tpu.dot_dimension_numbers<[1], [0], [0], [1], [0, 0, 1, 1], [], []>} : vector<64x8xbf16>, vector<8x8xbf16>, vector<64x8xf32> -> vector<64x8xf32>
    %30 = arith.addf %24, %29 : vector<64x8xf32>
    %c0_35 = arith.constant 0 : index
    %c1_36 = arith.constant 1 : index
    %c2_37 = arith.constant 2 : index
    %c0_38 = arith.constant 0 : index
    %31 = vector.load %arg2[%c0_35, %c1_36, %c2_37, %c0_38] : memref<1x10x10x8xbf16, #tpu.memory_space<vmem>>, vector<1x8x8x8xbf16>
    %32 = vector.shape_cast %31 : vector<1x8x8x8xbf16> to vector<64x8xbf16>
    %c5 = arith.constant 5 : index
    %c0_39 = arith.constant 0 : index
    %c0_40 = arith.constant 0 : index
    %33 = vector.load %arg3[%c5, %c0_39, %c0_40] : memref<9x8x8xbf16, #tpu.memory_space<vmem>>, vector<1x8x8xbf16>
    %34 = vector.shape_cast %33 : vector<1x8x8xbf16> to vector<8x8xbf16>
    %cst_41 = arith.constant dense<0.000000e+00> : vector<64x8xf32>
    %35 = tpu.matmul %32, %34, %cst_41 {dimension_numbers = #tpu.dot_dimension_numbers<[1], [0], [0], [1], [0, 0, 1, 1], [], []>} : vector<64x8xbf16>, vector<8x8xbf16>, vector<64x8xf32> -> vector<64x8xf32>
    %36 = arith.addf %30, %35 : vector<64x8xf32>
    %c0_42 = arith.constant 0 : index
    %c2_43 = arith.constant 2 : index
    %c0_44 = arith.constant 0 : index
    %c0_45 = arith.constant 0 : index
    %37 = vector.load %arg2[%c0_42, %c2_43, %c0_44, %c0_45] : memref<1x10x10x8xbf16, #tpu.memory_space<vmem>>, vector<1x8x8x8xbf16>
    %38 = vector.shape_cast %37 : vector<1x8x8x8xbf16> to vector<64x8xbf16>
    %c6 = arith.constant 6 : index
    %c0_46 = arith.constant 0 : index
    %c0_47 = arith.constant 0 : index
    %39 = vector.load %arg3[%c6, %c0_46, %c0_47] : memref<9x8x8xbf16, #tpu.memory_space<vmem>>, vector<1x8x8xbf16>
    %40 = vector.shape_cast %39 : vector<1x8x8xbf16> to vector<8x8xbf16>
    %cst_48 = arith.constant dense<0.000000e+00> : vector<64x8xf32>
    %41 = tpu.matmul %38, %40, %cst_48 {dimension_numbers = #tpu.dot_dimension_numbers<[1], [0], [0], [1], [0, 0, 1, 1], [], []>} : vector<64x8xbf16>, vector<8x8xbf16>, vector<64x8xf32> -> vector<64x8xf32>
    %42 = arith.addf %36, %41 : vector<64x8xf32>
    %c0_49 = arith.constant 0 : index
    %c2_50 = arith.constant 2 : index
    %c1_51 = arith.constant 1 : index
    %c0_52 = arith.constant 0 : index
    %43 = vector.load %arg2[%c0_49, %c2_50, %c1_51, %c0_52] : memref<1x10x10x8xbf16, #tpu.memory_space<vmem>>, vector<1x8x8x8xbf16>
    %44 = vector.shape_cast %43 : vector<1x8x8x8xbf16> to vector<64x8xbf16>
    %c7 = arith.constant 7 : index
    %c0_53 = arith.constant 0 : index
    %c0_54 = arith.constant 0 : index
    %45 = vector.load %arg3[%c7, %c0_53, %c0_54] : memref<9x8x8xbf16, #tpu.memory_space<vmem>>, vector<1x8x8xbf16>
    %46 = vector.shape_cast %45 : vector<1x8x8xbf16> to vector<8x8xbf16>
    %cst_55 = arith.constant dense<0.000000e+00> : vector<64x8xf32>
    %47 = tpu.matmul %44, %46, %cst_55 {dimension_numbers = #tpu.dot_dimension_numbers<[1], [0], [0], [1], [0, 0, 1, 1], [], []>} : vector<64x8xbf16>, vector<8x8xbf16>, vector<64x8xf32> -> vector<64x8xf32>
    %48 = arith.addf %42, %47 : vector<64x8xf32>
    %c0_56 = arith.constant 0 : index
    %c2_57 = arith.constant 2 : index
    %c2_58 = arith.constant 2 : index
    %c0_59 = arith.constant 0 : index
    %49 = vector.load %arg2[%c0_56, %c2_57, %c2_58, %c0_59] : memref<1x10x10x8xbf16, #tpu.memory_space<vmem>>, vector<1x8x8x8xbf16>
    %50 = vector.shape_cast %49 : vector<1x8x8x8xbf16> to vector<64x8xbf16>
    %c8 = arith.constant 8 : index
    %c0_60 = arith.constant 0 : index
    %c0_61 = arith.constant 0 : index
    %51 = vector.load %arg3[%c8, %c0_60, %c0_61] : memref<9x8x8xbf16, #tpu.memory_space<vmem>>, vector<1x8x8xbf16>
    %52 = vector.shape_cast %51 : vector<1x8x8xbf16> to vector<8x8xbf16>
    %cst_62 = arith.constant dense<0.000000e+00> : vector<64x8xf32>
    %53 = tpu.matmul %50, %52, %cst_62 {dimension_numbers = #tpu.dot_dimension_numbers<[1], [0], [0], [1], [0, 0, 1, 1], [], []>} : vector<64x8xbf16>, vector<8x8xbf16>, vector<64x8xf32> -> vector<64x8xf32>
    %54 = arith.addf %48, %53 : vector<64x8xf32>
    %c0_63 = arith.constant 0 : index
    %c0_64 = arith.constant 0 : index
    %55 = vector.load %arg4[%c0_63, %c0_64] : memref<1x8xf32, #tpu.memory_space<vmem>>, vector<1x8xf32>
    %56 = vector.broadcast %55 : vector<1x8xf32> to vector<64x8xf32>
    %57 = arith.mulf %54, %56 : vector<64x8xf32>
    %c0_65 = arith.constant 0 : index
    %c0_66 = arith.constant 0 : index
    %58 = vector.load %arg5[%c0_65, %c0_66] : memref<1x8xf32, #tpu.memory_space<vmem>>, vector<1x8xf32>
    %59 = vector.broadcast %58 : vector<1x8xf32> to vector<64x8xf32>
    %60 = arith.addf %57, %59 : vector<64x8xf32>
    %c0_67 = arith.constant 0 : index
    %c0_68 = arith.constant 0 : index
    %61 = vector.load %arg6[%c0_67, %c0_68] : memref<64x4xbf16, #tpu.memory_space<vmem>>, vector<64x4xbf16>
    %c0_69 = arith.constant 0 : index
    %c0_70 = arith.constant 0 : index
    %62 = vector.load %arg7[%c0_69, %c0_70] : memref<4x8xbf16, #tpu.memory_space<vmem>>, vector<4x8xbf16>
    %cst_71 = arith.constant dense<0.000000e+00> : vector<64x8xf32>
    %63 = tpu.matmul %61, %62, %cst_71 {dimension_numbers = #tpu.dot_dimension_numbers<[1], [0], [0], [1], [0, 0, 1, 1], [], []>} : vector<64x4xbf16>, vector<4x8xbf16>, vector<64x8xf32> -> vector<64x8xf32>
    %c0_72 = arith.constant 0 : index
    %c0_73 = arith.constant 0 : index
    %64 = vector.load %arg8[%c0_72, %c0_73] : memref<1x8xf32, #tpu.memory_space<vmem>>, vector<1x8xf32>
    %65 = vector.broadcast %64 : vector<1x8xf32> to vector<64x8xf32>
    %66 = arith.mulf %63, %65 : vector<64x8xf32>
    %67 = arith.addf %60, %66 : vector<64x8xf32>
    %c0_74 = arith.constant 0 : index
    %c0_75 = arith.constant 0 : index
    %68 = vector.load %arg9[%c0_74, %c0_75] : memref<1x8xf32, #tpu.memory_space<vmem>>, vector<1x8xf32>
    %69 = vector.broadcast %68 : vector<1x8xf32> to vector<64x8xf32>
    %70 = arith.addf %67, %69 : vector<64x8xf32>
    %cst_76 = arith.constant 0.000000e+00 : f32
    %71 = vector.broadcast %cst_76 : f32 to vector<64x8xf32>
    %72 = arith.maximumf %70, %71 : vector<64x8xf32>
    %73 = arith.truncf %72 : vector<64x8xf32> to vector<64x8xbf16>
    %c0_77 = arith.constant 0 : index
    %c0_78 = arith.constant 0 : index
    %74 = vector.load %arg10[%c0_77, %c0_78] : memref<64x8xbf16, #tpu.memory_space<vmem>>, vector<64x8xbf16>
    tpu.vector_store %arg10[%c0_77, %c0_78], %73 {strides = array<i32>} : memref<64x8xbf16, #tpu.memory_space<vmem>>, vector<64x8xbf16>,
    return
  }
  func.func @transform_0(%arg0: i32, %arg1: i32) -> (i32, i32, i32, i32) {
    %c0_i32 = arith.constant 0 : i32
    %c0_i32_0 = arith.constant 0 : i32
    %c0_i32_1 = arith.constant 0 : i32
    %c0_i32_2 = arith.constant 0 : i32
    return %arg0, %c0_i32, %c0_i32_0, %c0_i32_1 : i32, i32, i32, i32
  }
  func.func @transform_1(%arg0: i32, %arg1: i32) -> (i32, i32, i32) {
    %c0_i32 = arith.constant 0 : i32
    %c0_i32_0 = arith.constant 0 : i32
    %c0_i32_1 = arith.constant 0 : i32
    return %c0_i32, %c0_i32_0, %arg1 : i32, i32, i32
  }
  func.func @transform_2(%arg0: i32, %arg1: i32) -> (i32, i32) {
    %c0_i32 = arith.constant 0 : i32
    %c0_i32_0 = arith.constant 0 : i32
    return %c0_i32, %arg1 : i32, i32
  }
  func.func @transform_3(%arg0: i32, %arg1: i32) -> (i32, i32) {
    %c0_i32 = arith.constant 0 : i32
    %c0_i32_0 = arith.constant 0 : i32
    return %c0_i32, %arg1 : i32, i32
  }
  func.func @transform_4(%arg0: i32, %arg1: i32) -> (i32, i32) {
    %c0_i32 = arith.constant 0 : i32
    %c0_i32_0 = arith.constant 0 : i32
    return %arg0, %c0_i32 : i32, i32
  }
  func.func @transform_5(%arg0: i32, %arg1: i32) -> (i32, i32) {
    %c0_i32 = arith.constant 0 : i32
    %c0_i32_0 = arith.constant 0 : i32
    return %c0_i32, %arg1 : i32, i32
  }
  func.func @transform_6(%arg0: i32, %arg1: i32) -> (i32, i32) {
    %c0_i32 = arith.constant 0 : i32
    %c0_i32_0 = arith.constant 0 : i32
    return %c0_i32, %arg1 : i32, i32
  }
  func.func @transform_7(%arg0: i32, %arg1: i32) -> (i32, i32) {
    %c0_i32 = arith.constant 0 : i32
    %c0_i32_0 = arith.constant 0 : i32
    return %c0_i32, %arg1 : i32, i32
  }
  func.func @transform_8(%arg0: i32, %arg1: i32) -> (i32, i32) {
    %c0_i32 = arith.constant 0 : i32
    return %arg0, %arg1 : i32, i32
  }
}

</mosaic_0001>

<bundles_post_ra>
// kernel: basic_block_forward.2
= control target key start
LH: loop header
LB: loop body
LE: loop exit
PB: predicated region body
PF: predicated region fallthrough
CT: control target
= control target key end

     0   :  { %s1975_s24 = smov 0   ;;  %s1977_s25 = smov 0   ;;  %s2375_s0 = inlined_call_operand.vmem [shape: bf16[2,9,9,4], index: 0, kind: input, shape index: {}]   ;;  %s2376_s1 = inlined_call_operand.vmem [shape: bf16[2,9,9,4], index: 1, kind: input, shape index: {}]   ;;  %s2377_s2 = inlined_call_operand.vmem [shape: bf16[2,9,9,4], index: 2, kind: input, shape index: {}]   ;;  %s2378_s3 = inlined_call_operand.vmem [shape: bf16[2,9,9,4], index: 3, kind: input, shape index: {}]   ;;  %s2379_s4 = inlined_call_operand.vmem [shape: bf16[9,4,8], index: 4, kind: input, shape index: {}]   ;;  %s2380_s5 = inlined_call_operand.vmem [shape: f32[1,8], index: 5, kind: input, shape index: {}]   ;;  %s2381_s6 = inlined_call_operand.vmem [shape: f32[1,8], index: 6, kind: input, shape index: {}]   ;;  %s2382_s7 = inlined_call_operand.vmem [shape: bf16[128,8], index: 7, kind: output, shape index: {}]  }
   0x1   :  { %s1979_s26 = smov 0  }
   0x2 LB: > { %s29_s27 = sadd.s32 1, %s1929_s25  ;;  %p1676_p0 = scmp.ge.s32.totalorder %s1933_s26, 1  ;;  %s1933_s26 = sphi %s1979_s26, %s17_s26   ;;  %s1929_s25 = sphi %s1977_s25, %s2386_s25   ;;  %s1925_s24 = sphi %s1975_s24, %s2385_s24  }
   0x3   : > { %p31_p1 = scmp.ge.s32.totalorder %s29_s27, 2  ;;  %p306_p2 = scmp.lt.s32.totalorder %s1933_s26, 3 }
   0x5   : > { %s2388_s27 = smov (%p31_p1, %s29_s27), 0  ;;  %p307_p3 = pnand %p1676_p0, %p306_p2 }
   0x6   : > { %p366_p4 = scmp.lt.s32.totalorder (!%p307_p3), %s1925_s24, 1 }
   0x7   : > { %310 = sbr.rel (%p307_p3) target bundleno = 304 (0x130), region = 48 }
   0xc   : > { %v1683_v0 = vld [vmem:[%s2379_s4 + $0x2] sm:$0x3]  ;;  %vm458_vm0 = vcmask 1041408   ;;  %v1724_v2 = vld [vmem:[%s2379_s4 + $0x4] sm:$0x3]  ;;  %s367_s11 = scalar_select %p366_p4, %s1925_s24, 1 }
   0xd   : > { %v460_v1 = vsel %vm458_vm0, %v1683_v0, 0  ;;  %v1729_v3 = vld [vmem:[%s2379_s4 + $0x6] sm:$0x3]  ;;  %v713_v4 = vsel %vm458_vm0, %v1724_v2, 0  ;;  %v414_v6 = vld [vmem:[%s2379_s4] sm:$0x3] }
   0xe   : > { %1881 = vmatpush.bf16.msra.mxu1 %v460_v1  ;;  %1882 = vmatpush.bf16.msra.mxu2 %v460_v1  ;;  %v795_v5 = vsel %vm458_vm0, %v1729_v3, 0  ;;  %v524_v7 = vsel %vm458_vm0, %v414_v6, 0  ;;  %v1750_v8 = vld [vmem:[%s2379_s4 + $0x8] sm:$0x3]  ;;  %s2016_s16 = smul.u32 72, %s367_s11  ;;  %vm445_vm1 = vcmask 31744  }
   0xf   : > { %1883 = vmatpush.bf16.msra.mxu3 %v460_v1  ;;  %469 = vmatpush.bf16.msra.mxu0 %v460_v1  ;;  %v877_v9 = vsel %vm458_vm0, %v1750_v8, 0  ;;  %v1784_v10 = vld [vmem:[%s2379_s4 + $0xc] sm:$0x3]  ;;  %v1813_v11 = vld [vmem:[%s2379_s4 + $0xe] sm:$0x3]  ;;  %vm1510_vm5 = vcmask 60416  }
  0x10   : > { %s2026_s21 = scalar_lea.vmem %s2376_s1, %s2016_s16  ;;  %v1771_v12 = vld [vmem:[%s2379_s4 + $0xa] sm:$0x3]  ;;  %s2038_s9 = scalar_lea.vmem %s2375_s0, %s2016_s16  ;;  %v1154_v24 = vsel %vm458_vm0, %v1784_v10, 0  ;;  %v1237_v28 = vsel %vm458_vm0, %v1813_v11, 0  ;;  %v1850_v38 = vld [vmem:[%s2379_s4 + $0x10] sm:$0x3] }
  0x11   : > { %v1690_v13 = vld [vmem:[%s2026_s21 + $0x10] sm:$0xf]  ;;  %v1862_v14 = vld [vmem:[%s2026_s21 + $0x14] sm:$0xf0]  ;;  %v1694_v15 = vld [vmem:[%s2026_s21 + $0x20] sm:$0xf]  ;;  %s2067_s14 = scalar_lea.vmem %s2377_s2, %s2016_s16  ;;  %s2080_s18 = scalar_lea.vmem %s2378_s3, %s2016_s16 }
  0x12   : > { %722 = vmatpush.bf16.msrb.mxu2 %v713_v4  ;;  %533 = vmatpush.bf16.msrb.mxu1 %v524_v7  ;;  %v1691_v16 = vor.u32 %v1862_v14, %v1690_v13  ;;  %v1863_v17 = vld [vmem:[%s2026_s21 + $0x24] sm:$0xf0]  ;;  %v1698_v18 = vld [vmem:[%s2026_s21 + $0x30] sm:$0xf]  ;;  %v1864_v19 = vld [vmem:[%s2026_s21 + $0x34] sm:$0xf0] }
  0x13   : > { %804 = vmatpush.bf16.msrb.mxu3 %v795_v5  ;;  %886 = vmatpush.bf16.msrb.mxu0 %v877_v9  ;;  %v1695_v20 = vor.u32 %v1863_v17, %v1694_v15  ;;  %v1699_v21 = vor.u32 %v1864_v19, %v1698_v18  ;;  %v1686_v22 = vld [vmem:[%s2026_s21] sm:$0xf]  ;;  %v1861_v23 = vld [vmem:[%s2026_s21 + $0x4] sm:$0xf0]  ;;  %v556_v27 = vld [vmem:[%s2038_s9 + $0x4] sm:$0x1] }
  0x14   : > { %1701 = vmatmul.msk.bf16.vlgmr.msra.gmra.mxu1 %vm445_vm1, %v1691_v16  ;;  %v1687_v25 = vor.u32 %v1861_v23, %v1686_v22  ;;  %v555_v26 = vld [vmem:[%s2038_s9] sm:$0xf]  ;;  %v1071_v29 = vsel %vm458_vm0, %v1771_v12, 0  ;;  %v557_v30 = vld [vmem:[%s2038_s9 + $0x8] sm:$0xf]  ;;  %v584_v34 = vshll.u32 %v556_v27, 16 }
  0x15   : > { %1702 = vmatmul.msk.bf16.vlgmr.msra.gmra.mxu2 %vm445_vm1, %v1695_v20  ;;  %1703 = vmatmul.msk.bf16.vlgmr.msra.gmra.mxu3 %vm445_vm1, %v1699_v21  ;;  %v558_v31 = vld [vmem:[%s2038_s9 + $0xc] sm:$0x1]  ;;  %v575_v32 = vshrl.u32 %v555_v26, 16  ;;  %v578_v33 = vshll.u32 %v555_v26, 16  ;;  %v589_v35 = vshrl.u32 %v557_v30, 16  ;;  %v592_v36 = vshll.u32 %v557_v30, 16 }
  0x16   : > { %1700 = vmatmul.msk.bf16.vlgmr.msra.gmra.mxu0 %vm445_vm1, %v1687_v25  ;;  %v598_v37 = vshll.u32 %v558_v31, 16  ;;  %1163 = vmatpush.bf16.msra.mxu2 %v1154_v24  ;;  %vm571_vm2 = vsmask.f32 3328  ;;  %vm572_vm3 = vsmask.f32 7440  ;;  %v586_v44 = vrot.slane %v584_v34, 5 }
  0x17   : > { %v577_v39 = vrot.slane %v575_v32, 4  ;;  %v580_v40 = vrot.slane %v578_v33, 5  ;;  %1246 = vmatpush.bf16.msra.mxu3 %v1237_v28  ;;  %1080 = vmatpush.bf16.msra.mxu1 %v1071_v29  ;;  %v591_v41 = vrot.slane %v589_v35, 4  ;;  %v594_v42 = vrot.slane %v592_v36, 5  ;;  %vm2069_vm4 = vmor %vm571_vm2, %vm572_vm3  ;;  %v559_v49 = vld [vmem:[%s2038_s9 + $0x10] sm:$0xf] }
  0x18   : > { %v1431_v45 = vsel %vm458_vm0, %v1850_v38, 0  ;;  %v600_v48 = vrot.slane %v598_v37, 5  ;;  %v561_v50 = vld [vmem:[%s2038_s9 + $0x18] sm:$0xf]  ;;  %v1706_v51 = vld [vmem:[%s2038_s9] sm:$0xf] }
  0x19   : > { %v581_v43 = vor.u32 %v580_v40, %v577_v39  ;;  %v595_v47 = vor.u32 %v594_v42, %v591_v41  ;;  %1440 = vmatpush.bf16.msra.mxu0 %v1431_v45  ;;  %v603_v53 = vshrl.u32 %v559_v49, 16  ;;  %v606_v54 = vshll.u32 %v559_v49, 16  ;;  %v1857_v55 = vld [vmem:[%s2038_s9 + $0x4] sm:$0xf0]  ;;  %v1732_v60 = vld [vmem:[%s2067_s14] sm:$0xf] }
  0x1a   : > { %v617_v57 = vshrl.u32 %v561_v50, 16  ;;  %v620_v58 = vshll.u32 %v561_v50, 16  ;;  %v1865_v61 = vld [vmem:[%s2067_s14 + $0x4] sm:$0xf0]  ;;  %v1753_v2 = vld [vmem:[%s2080_s18] sm:$0xf]  ;;  %v1707_v9 = vor.u32 %v1857_v55, %v1706_v51 }
  0x1b   : > { %v582_v52 = vrot.slane %v581_v43, 4  ;;  %v596_v56 = vrot.slane %v595_v47, 4  ;;  %v605_v62 = vrot.slane %v603_v53, 4  ;;  %v608_v63 = vrot.slane %v606_v54, 5  ;;  %v1869_v3 = vld [vmem:[%s2080_s18 + $0x4] sm:$0xf0] }
  0x1c   : > { %v619_v4 = vrot.slane %v617_v57, 4  ;;  %v622_v5 = vrot.slane %v620_v58, 5  ;;  %v560_v7 = vld [vmem:[%s2038_s9 + $0x14] sm:$0x1]  ;;  %v562_v8 = vld [vmem:[%s2038_s9 + $0x1c] sm:$0x1]  ;;  %v1733_v11 = vor.u32 %v1865_v61, %v1732_v60  ;;  %v1754_v12 = vor.u32 %v1869_v3, %v1753_v2 }
  0x1d   : > { %v587_v59 = vsel %vm2069_vm4, %v582_v52, %v586_v44  ;;  %v601_v0 = vsel %vm2069_vm4, %v596_v56, %v600_v48  ;;  %v609_v13 = vor.u32 %v608_v63, %v605_v62  ;;  %v612_v14 = vshll.u32 %v560_v7, 16  ;;  %v563_v21 = vld [vmem:[%s2038_s9 + $0x20] sm:$0xf]  ;;  %v565_v22 = vld [vmem:[%s2038_s9 + $0x28] sm:$0xf]  ;;  %s1681_s16 = sshll.u32 %s1925_s24, 3 }
  0x1e   : > { %v688_v1 = vunpack.c.l.b16 %v587_v59  ;;  %v689_v6 = vunpack.c.l.b16 %v601_v0  ;;  %v623_v15 = vor.u32 %v622_v5, %v619_v4  ;;  %v626_v16 = vshll.u32 %v562_v8, 16  ;;  %v1710_v29 = vld [vmem:[%s2038_s9 + $0x10] sm:$0xf]  ;;  %v1858_v30 = vld [vmem:[%s2038_s9 + $0x14] sm:$0xf0]  ;;  %p397_p5 = scmp.lt.s32.totalorder %s1681_s16, 15 }
  0x1f   : > { %v610_v17 = vrot.slane %v609_v13, 4  ;;  %v614_v18 = vrot.slane %v612_v14, 5  ;;  %v631_v23 = vshrl.u32 %v563_v21, 16  ;;  %v634_v24 = vshll.u32 %v563_v21, 16  ;;  %v1736_v33 = vld [vmem:[%s2067_s14 + $0x10] sm:$0xf] }
  0x20   : > { %v696_v10 = vpack.c.b16 %v689_v6, %v688_v1  ;;  %v624_v19 = vrot.slane %v623_v15, 4  ;;  %v628_v20 = vrot.slane %v626_v16, 5  ;;  %v645_v27 = vshrl.u32 %v565_v22, 16  ;;  %v1866_v34 = vld [vmem:[%s2067_s14 + $0x14] sm:$0xf0]  ;;  %s2390_s16 = smov (!%p397_p5, %s1681_s16), 15 }
  0x21   : > { %v615_v25 = vsel %vm2069_vm4, %v610_v17, %v614_v18  ;;  %v648_v28 = vshll.u32 %v565_v22, 16  ;;  %v1757_v35 = vld [vmem:[%s2080_s18 + $0x10] sm:$0xf]  ;;  %v1870_v36 = vld [vmem:[%s2080_s18 + $0x14] sm:$0xf0]  ;;  %v633_v37 = vrot.slane %v631_v23, 4  ;;  %v1711_v43 = vor.u32 %v1858_v30, %v1710_v29 }
  0x22   : > { %v629_v26 = vsel %vm2069_vm4, %v624_v19, %v628_v20  ;;  %v690_v31 = vunpack.c.l.b16 %v615_v25  ;;  %v636_v38 = vrot.slane %v634_v24, 5  ;;  %v647_v39 = vrot.slane %v645_v27, 4  ;;  %v564_v41 = vld [vmem:[%s2038_s9 + $0x24] sm:$0x1]  ;;  %v566_v42 = vld [vmem:[%s2038_s9 + $0x2c] sm:$0x1] }
  0x23   : > { %v691_v32 = vunpack.c.l.b16 %v629_v26  ;;  %v650_v40 = vrot.slane %v648_v28, 5  ;;  %v1737_v45 = vor.u32 %v1866_v34, %v1736_v33  ;;  %v1758_v47 = vor.u32 %v1870_v36, %v1757_v35  ;;  %v567_v52 = vld [vmem:[%s2038_s9 + $0x30] sm:$0xf]  ;;  %v569_v53 = vld [vmem:[%s2038_s9 + $0x38] sm:$0xf]  ;;  %s1682_s22 = sshll.u32 %s2390_s16, 2 }
  0x24   : > { %1720 = vmatmul.msk.bf16.vlgmr.msrb.gmra.mxu1 %vm445_vm1, %v1707_v9  ;;  %v637_v48 = vor.u32 %v636_v38, %v633_v37  ;;  %v640_v49 = vshll.u32 %v564_v41, 16  ;;  %v654_v51 = vshll.u32 %v566_v42, 16  ;;  %v659_v58 = vshrl.u32 %v567_v52, 16  ;;  %v568_v4 = vld [vmem:[%s2038_s9 + $0x34] sm:$0x1]  ;;  %s2311_s29 = scalar_lea.vmem %s2382_s7, %s1682_s22 }
  0x25   : > { %1725 = vmatmul.msk.bf16.vlgmr.msrb.gmra.mxu2 %vm445_vm1, %v696_v10  ;;  %1746 = vmatmul.msk.bf16.vlgmr.msrb.gmra.mxu3 %vm445_vm1, %v1733_v11  ;;  %v697_v44 = vpack.c.b16 %v691_v32, %v690_v31  ;;  %v651_v50 = vor.u32 %v650_v40, %v647_v39  ;;  %v662_v59 = vshll.u32 %v567_v52, 16  ;;  %v673_v60 = vshrl.u32 %v569_v53, 16  ;;  %v570_v5 = vld [vmem:[%s2038_s9 + $0x3c] sm:$0x1]  ;;  %v1714_v6 = vld [vmem:[%s2038_s9 + $0x20] sm:$0xf] }
  0x26   : > { %1767 = vmatmul.msk.bf16.vlgmr.msrb.gmra.mxu0 %vm445_vm1, %v1754_v12  ;;  %v638_v54 = vrot.slane %v637_v48, 4  ;;  %v642_v55 = vrot.slane %v640_v49, 5  ;;  %v656_v57 = vrot.slane %v654_v51, 5  ;;  %v676_v61 = vshll.u32 %v569_v53, 16  ;;  %v1859_v7 = vld [vmem:[%s2038_s9 + $0x24] sm:$0xf0] }
  0x27   : > { %v652_v56 = vrot.slane %v651_v50, 4  ;;  %v661_v0 = vrot.slane %v659_v58, 4  ;;  %v664_v1 = vrot.slane %v662_v59, 5  ;;  %v675_v2 = vrot.slane %v673_v60, 4  ;;  %v1740_v10 = vld [vmem:[%s2067_s14 + $0x20] sm:$0xf] }
  0x28   : > { %v643_v62 = vsel %vm2069_vm4, %v638_v54, %v642_v55  ;;  %v678_v3 = vrot.slane %v676_v61, 5  ;;  %v1867_v11 = vld [vmem:[%s2067_s14 + $0x24] sm:$0xf0]  ;;  %v1761_v12 = vld [vmem:[%s2080_s18 + $0x20] sm:$0xf]  ;;  %v668_v15 = vshll.u32 %v568_v4, 16  ;;  %v1715_v18 = vor.u32 %v1859_v7, %v1714_v6 }
  0x29   : > { %v657_v63 = vsel %vm2069_vm4, %v652_v56, %v656_v57  ;;  %v692_v8 = vunpack.c.l.b16 %v643_v62  ;;  %v1871_v13 = vld [vmem:[%s2080_s18 + $0x24] sm:$0xf0]  ;;  %v665_v14 = vor.u32 %v664_v1, %v661_v0  ;;  %v682_v17 = vshll.u32 %v570_v5, 16  ;;  %v916_v26 = vld [vmem:[%s2067_s14] sm:$0xf] }
  0x2a   : > { %v693_v9 = vunpack.c.l.b16 %v657_v63  ;;  %v679_v16 = vor.u32 %v678_v3, %v675_v2  ;;  %v1741_v20 = vor.u32 %v1867_v11, %v1740_v10  ;;  %v1762_v21 = vor.u32 %v1871_v13, %v1761_v12  ;;  %v918_v27 = vld [vmem:[%s2067_s14 + $0x8] sm:$0xf]  ;;  %v1836_v29 = vld [vmem:[%s2038_s9 + $0x10] sm:$0xf]  ;;  %v1860_v41 = vld [vmem:[%s2038_s9 + $0x34] sm:$0xf0] }
  0x2b   : > { %v666_v22 = vrot.slane %v665_v14, 4  ;;  %v670_v23 = vrot.slane %v668_v15, 5  ;;  %v684_v25 = vrot.slane %v682_v17, 5  ;;  %v1834_v28 = vld [vmem:[%s2038_s9 + $0x8] sm:$0xf]  ;;  %v933_v32 = vshrl.u32 %v916_v26, 16 }
  0x2c   : > { %v698_v19 = vpack.c.b16 %v693_v9, %v692_v8  ;;  %v680_v24 = vrot.slane %v679_v16, 4  ;;  %v936_v33 = vshll.u32 %v916_v26, 16  ;;  %v947_v34 = vshrl.u32 %v918_v27, 16  ;;  %v1718_v40 = vld [vmem:[%s2038_s9 + $0x30] sm:$0xf] }
  0x2d   : > { %v671_v30 = vsel %vm2069_vm4, %v666_v22, %v670_v23  ;;  %v950_v35 = vshll.u32 %v918_v27, 16  ;;  %v1293_v36 = vshrl.u32 %v1834_v28, 16  ;;  %v1296_v37 = vshll.u32 %v1834_v28, 16  ;;  %v919_v52 = vld [vmem:[%s2067_s14 + $0xc] sm:$0x1] }
  0x2e   : > { %v685_v31 = vsel %vm2069_vm4, %v680_v24, %v684_v25  ;;  %v1307_v38 = vshrl.u32 %v1836_v29, 16  ;;  %v1310_v39 = vshll.u32 %v1836_v29, 16  ;;  %v694_v42 = vunpack.c.l.b16 %v671_v30  ;;  %v1835_v57 = vld [vmem:[%s2038_s9 + $0xc] sm:$0x1]  ;;  %v1837_v58 = vld [vmem:[%s2038_s9 + $0x14] sm:$0x1] }
  0x2f   : > { %v935_v48 = vrot.slane %v933_v32, 4  ;;  %v938_v49 = vrot.slane %v936_v33, 5  ;;  %v949_v50 = vrot.slane %v947_v34, 4  ;;  %v952_v51 = vrot.slane %v950_v35, 5  ;;  %v1765_v62 = vld [vmem:[%s2080_s18 + $0x30] sm:$0xf] }
  0x30   : > { %v1295_v53 = vrot.slane %v1293_v36, 4  ;;  %v1298_v54 = vrot.slane %v1296_v37, 5  ;;  %v1309_v55 = vrot.slane %v1307_v38, 4  ;;  %v1312_v56 = vrot.slane %v1310_v39, 5  ;;  %v1872_v63 = vld [vmem:[%s2080_s18 + $0x34] sm:$0xf0] }
  0x31   : > { %v1719_v59 = vor.u32 %v1860_v41, %v1718_v40  ;;  %v939_v0 = vor.u32 %v938_v49, %v935_v48  ;;  %v953_v2 = vor.u32 %v952_v51, %v949_v50  ;;  %v956_v3 = vshll.u32 %v919_v52, 16  ;;  %v920_v9 = vld [vmem:[%s2067_s14 + $0x10] sm:$0xf]  ;;  %v922_v10 = vld [vmem:[%s2067_s14 + $0x18] sm:$0xf] }
  0x32   : > { %v1299_v4 = vor.u32 %v1298_v54, %v1295_v53  ;;  %v1302_v5 = vshll.u32 %v1835_v57, 16  ;;  %v1313_v6 = vor.u32 %v1312_v56, %v1309_v55  ;;  %v1316_v7 = vshll.u32 %v1837_v58, 16  ;;  %v1838_v23 = vld [vmem:[%s2038_s9 + $0x18] sm:$0xf]  ;;  %v1840_v24 = vld [vmem:[%s2038_s9 + $0x20] sm:$0xf] }
  0x33   : > { %v1766_v8 = vor.u32 %v1872_v63, %v1765_v62  ;;  %v940_v11 = vrot.slane %v939_v0, 4  ;;  %v954_v13 = vrot.slane %v953_v2, 4  ;;  %v958_v14 = vrot.slane %v956_v3, 5  ;;  %v921_v29 = vld [vmem:[%s2067_s14 + $0x14] sm:$0x1] }
  0x34   : > { %1721 = vmatmul.msk.bf16.gmra.mxu1 %vm445_vm1, %v1711_v43  ;;  %v695_v43 = vunpack.c.l.b16 %v685_v31  ;;  %v1300_v15 = vrot.slane %v1299_v4, 4  ;;  %v1304_v16 = vrot.slane %v1302_v5, 5  ;;  %v1314_v17 = vrot.slane %v1313_v6, 4  ;;  %v923_v34 = vld [vmem:[%s2067_s14 + $0x1c] sm:$0x1] }
  0x35   : > { %1726 = vmatmul.msk.bf16.gmra.mxu2 %vm445_vm1, %v697_v44  ;;  %1747 = vmatmul.msk.bf16.gmra.mxu3 %vm445_vm1, %v1737_v45  ;;  %v1744_v44 = vld [vmem:[%s2067_s14 + $0x30] sm:$0xf]  ;;  %v1868_v45 = vld [vmem:[%s2067_s14 + $0x34] sm:$0xf0]  ;;  %v978_v22 = vshll.u32 %v922_v10, 16  ;;  %v959_v26 = vsel %vm2069_vm4, %v954_v13, %v958_v14  ;;  %v1321_v35 = vshrl.u32 %v1838_v23, 16 }
  0x36   : > { %1768 = vmatmul.msk.bf16.gmra.mxu0 %vm445_vm1, %v1758_v47  ;;  %v917_v47 = vld [vmem:[%s2067_s14 + $0x4] sm:$0x1]  ;;  %v699_v60 = vpack.c.b16 %v695_v43, %v694_v42  ;;  %v1745_v61 = vor.u32 %v1868_v45, %v1744_v44  ;;  %v1305_v27 = vsel %vm2069_vm4, %v1300_v15, %v1304_v16  ;;  %v1324_v36 = vshll.u32 %v1838_v23, 16  ;;  %v1787_v41 = vld [vmem:[%s2038_s9 + $0x8] sm:$0xf] }
  0x37   : > { %v942_v1 = vshll.u32 %v917_v47, 16  ;;  %v980_v33 = vrot.slane %v978_v22, 5  ;;  %v1335_v37 = vshrl.u32 %v1840_v24, 16  ;;  %v1338_v38 = vshll.u32 %v1840_v24, 16  ;;  %v1873_v42 = vld [vmem:[%s2038_s9 + $0xc] sm:$0xf0] }
  0x38   : > { %v1047_v40 = vunpack.c.l.b16 %v959_v26  ;;  %v1406_v43 = vunpack.c.l.b16 %v1305_v27  ;;  %v1816_v45 = vld [vmem:[%s2026_s21 + $0x8] sm:$0xf]  ;;  %v1877_v47 = vld [vmem:[%s2026_s21 + $0xc] sm:$0xf0]  ;;  %v970_v49 = vshll.u32 %v921_v29, 16  ;;  %v984_v51 = vshll.u32 %v923_v34, 16 }
  0x39   : > { %v944_v12 = vrot.slane %v942_v1, 5  ;;  %v1323_v52 = vrot.slane %v1321_v35, 4  ;;  %v1326_v53 = vrot.slane %v1324_v36, 5  ;;  %v1337_v54 = vrot.slane %v1335_v37, 4  ;;  %v1839_v57 = vld [vmem:[%s2038_s9 + $0x1c] sm:$0x1] }
  0x3a   : > { %v1340_v55 = vrot.slane %v1338_v38, 5  ;;  %v1841_v58 = vld [vmem:[%s2038_s9 + $0x24] sm:$0x1]  ;;  %v972_v63 = vrot.slane %v970_v49, 5  ;;  %v986_v1 = vrot.slane %v984_v51, 5  ;;  %v1330_v3 = vshll.u32 %v1839_v57, 16 }
  0x3b   : > { %v945_v25 = vsel %vm2069_vm4, %v940_v11, %v944_v12  ;;  %v1327_v2 = vor.u32 %v1326_v53, %v1323_v52  ;;  %v1344_v5 = vshll.u32 %v1841_v58, 16  ;;  %v924_v6 = vld [vmem:[%s2067_s14 + $0x20] sm:$0xf]  ;;  %v1844_v15 = vld [vmem:[%s2038_s9 + $0x30] sm:$0xf] }
  0x3c   : > { %v1046_v39 = vunpack.c.l.b16 %v945_v25  ;;  %v1341_v4 = vor.u32 %v1340_v55, %v1337_v54  ;;  %v1332_v12 = vrot.slane %v1330_v3, 5  ;;  %v989_v16 = vshrl.u32 %v924_v6, 16  ;;  %v1874_v29 = vld [vmem:[%s2038_s9 + $0x1c] sm:$0xf0]  ;;  %v925_v35 = vld [vmem:[%s2067_s14 + $0x24] sm:$0x1] }
  0x3d   : > { %v1328_v11 = vrot.slane %v1327_v2, 4  ;;  %v1346_v14 = vrot.slane %v1344_v5, 5  ;;  %v1363_v22 = vshrl.u32 %v1844_v15, 16  ;;  %v1366_v23 = vshll.u32 %v1844_v15, 16  ;;  %v927_v36 = vld [vmem:[%s2067_s14 + $0x2c] sm:$0x1] }
  0x3e   : > { %v1054_v56 = vpack.c.b16 %v1047_v40, %v1046_v39  ;;  %v1342_v13 = vrot.slane %v1341_v4, 4  ;;  %v1878_v39 = vld [vmem:[%s2026_s21 + $0x1c] sm:$0xf0]  ;;  %v998_v49 = vshll.u32 %v925_v35, 16  ;;  %v1012_v51 = vshll.u32 %v927_v36, 16 }
  0x3f   : > { %v1333_v26 = vsel %vm2069_vm4, %v1328_v11, %v1332_v12  ;;  %v928_v3 = vld [vmem:[%s2067_s14 + $0x30] sm:$0xf]  ;;  %v930_v4 = vld [vmem:[%s2067_s14 + $0x38] sm:$0xf] }
  0x40   : > { %v1347_v27 = vsel %vm2069_vm4, %v1342_v13, %v1346_v14  ;;  %v1408_v40 = vunpack.c.l.b16 %v1333_v26  ;;  %v1031_v11 = vshrl.u32 %v930_v4, 16  ;;  %v1034_v12 = vshll.u32 %v930_v4, 16  ;;  %v1828_v4 = vld [vmem:[%s2026_s21 + $0x38] sm:$0xf] }
  0x44   : > { %1722 = vmatmul.msk.bf16.gmra.mxu1 %vm445_vm1, %v1715_v18  ;;  %v1318_v18 = vrot.slane %v1316_v7, 5  ;;  %v926_v7 = vld [vmem:[%s2067_s14 + $0x28] sm:$0xf] }
  0x45   : > { %1727 = vmatmul.msk.bf16.gmra.mxu2 %vm445_vm1, %v698_v19  ;;  %1748 = vmatmul.msk.bf16.gmra.mxu3 %vm445_vm1, %v1741_v20  ;;  %v961_v19 = vshrl.u32 %v920_v9, 16  ;;  %v964_v20 = vshll.u32 %v920_v9, 16 }
  0x46   : > { %1769 = vmatmul.msk.bf16.gmra.mxu0 %vm445_vm1, %v1762_v21  ;;  %v975_v21 = vshrl.u32 %v922_v10, 16  ;;  %v1319_v28 = vsel %vm2069_vm4, %v1314_v17, %v1318_v18  ;;  %v1842_v10 = vld [vmem:[%s2038_s9 + $0x28] sm:$0xf]  ;;  %v992_v17 = vshll.u32 %v924_v6, 16  ;;  %v1003_v18 = vshrl.u32 %v926_v7, 16 }
  0x47   : > { %v963_v30 = vrot.slane %v961_v19, 4  ;;  %v966_v31 = vrot.slane %v964_v20, 5  ;;  %v1407_v44 = vunpack.c.l.b16 %v1319_v28  ;;  %v1006_v19 = vshll.u32 %v926_v7, 16  ;;  %v1791_v28 = vld [vmem:[%s2038_s9 + $0x18] sm:$0xf] }
  0x48   : > { %v977_v32 = vrot.slane %v975_v21, 4  ;;  %v1349_v20 = vshrl.u32 %v1842_v10, 16  ;;  %v1352_v21 = vshll.u32 %v1842_v10, 16  ;;  %v1792_v52 = vor.u32 %v1874_v29, %v1791_v28  ;;  %v1846_v7 = vld [vmem:[%s2038_s9 + $0x38] sm:$0xf] }
  0x49   : > { %v967_v48 = vor.u32 %v966_v31, %v963_v30  ;;  %v1820_v30 = vld [vmem:[%s2026_s21 + $0x18] sm:$0xf]  ;;  %v991_v31 = vrot.slane %v989_v16, 4  ;;  %v1008_v34 = vrot.slane %v1006_v19, 5  ;;  %v1020_v10 = vshll.u32 %v928_v3, 16 }
  0x4a   : > { %v981_v50 = vor.u32 %v980_v33, %v977_v32  ;;  %v994_v32 = vrot.slane %v992_v17, 5  ;;  %v1005_v33 = vrot.slane %v1003_v18, 4  ;;  %v1351_v37 = vrot.slane %v1349_v20, 4 }
  0x4b   : > { %v968_v62 = vrot.slane %v967_v48, 4  ;;  %v1354_v38 = vrot.slane %v1352_v21, 5  ;;  %v1821_v53 = vor.u32 %v1878_v39, %v1820_v30  ;;  %v1377_v15 = vshrl.u32 %v1846_v7, 16  ;;  %v1795_v21 = vld [vmem:[%s2038_s9 + $0x28] sm:$0xf] }
  0x4c   : > { %v982_v0 = vrot.slane %v981_v50, 4  ;;  %v995_v48 = vor.u32 %v994_v32, %v991_v31  ;;  %v1009_v50 = vor.u32 %v1008_v34, %v1005_v33  ;;  %v1380_v16 = vshll.u32 %v1846_v7, 16  ;;  %v929_v31 = vld [vmem:[%s2067_s14 + $0x34] sm:$0x1]  ;;  %v931_v32 = vld [vmem:[%s2067_s14 + $0x3c] sm:$0x1] }
  0x4d   : > { %v1355_v54 = vor.u32 %v1354_v38, %v1351_v37  ;;  %v1022_v26 = vrot.slane %v1020_v10, 5  ;;  %v1036_v28 = vrot.slane %v1034_v12, 5  ;;  %v1379_v33 = vrot.slane %v1377_v15, 4 }
  0x4e   : > { %v987_v9 = vsel %vm2069_vm4, %v982_v0, %v986_v1  ;;  %v1382_v34 = vrot.slane %v1380_v16, 5 }
  0x4f   : > { %v1049_v25 = vunpack.c.l.b16 %v987_v9  ;;  %v1017_v9 = vshrl.u32 %v928_v3, 16  ;;  %v1876_v3 = vld [vmem:[%s2038_s9 + $0x3c] sm:$0xf0] }
  0x54   : > { %1723 = vmatmul.msk.bf16.gmra.mxu1 %vm445_vm1, %v1719_v59  ;;  %v1788_v59 = vor.u32 %v1873_v42, %v1787_v41  ;;  %v1409_v41 = vunpack.c.l.b16 %v1347_v27  ;;  %v1843_v42 = vld [vmem:[%s2038_s9 + $0x2c] sm:$0x1]  ;;  %v1033_v27 = vrot.slane %v1031_v11, 4 }
  0x55   : > { %1728 = vmatmul.msk.bf16.gmra.mxu2 %vm445_vm1, %v699_v60  ;;  %1749 = vmatmul.msk.bf16.gmra.mxu3 %vm445_vm1, %v1745_v61  ;;  %v1817_v60 = vor.u32 %v1877_v47, %v1816_v45  ;;  %v1414_v61 = vpack.c.b16 %v1407_v44, %v1406_v43  ;;  %v1365_v43 = vrot.slane %v1363_v22, 4  ;;  %v1368_v44 = vrot.slane %v1366_v23, 5  ;;  %v1845_v47 = vld [vmem:[%s2038_s9 + $0x34] sm:$0x1]  ;;  %v1875_v22 = vld [vmem:[%s2038_s9 + $0x2c] sm:$0xf0] }
  0x56   : > { %1770 = vmatmul.msk.bf16.gmra.mxu0 %vm445_vm1, %v1766_v8  ;;  %v973_v8 = vsel %vm2069_vm4, %v968_v62, %v972_v63  ;;  %v1358_v55 = vshll.u32 %v1843_v42, 16  ;;  %v1372_v58 = vshll.u32 %v1845_v47, 16  ;;  %v1014_v62 = vrot.slane %v1012_v51, 5  ;;  %v1824_v23 = vld [vmem:[%s2026_s21 + $0x28] sm:$0xf] }
  0x57   : > { %v1048_v24 = vunpack.c.l.b16 %v973_v8  ;;  %v1369_v57 = vor.u32 %v1368_v44, %v1365_v43  ;;  %v1356_v63 = vrot.slane %v1355_v54, 4  ;;  %v1848_v8 = vld [vmem:[%s2038_s9 + $0x40] sm:$0xf]  ;;  %v1796_v38 = vor.u32 %v1875_v22, %v1795_v21 }
  0x58   : > { %v1360_v0 = vrot.slane %v1358_v55, 5  ;;  %v1374_v2 = vrot.slane %v1372_v58, 5  ;;  %v1391_v17 = vshrl.u32 %v1848_v8, 16  ;;  %v1394_v18 = vshll.u32 %v1848_v8, 16 }
  0x59   : > { %v1055_v45 = vpack.c.b16 %v1049_v25, %v1048_v24  ;;  %v1370_v1 = vrot.slane %v1369_v57, 4  ;;  %v1879_v24 = vld [vmem:[%s2026_s21 + $0x2c] sm:$0xf0]  ;;  %v1019_v25 = vrot.slane %v1017_v9, 4  ;;  %v1026_v43 = vshll.u32 %v929_v31, 16 }
  0x5a   : > { %v1361_v13 = vsel %vm2069_vm4, %v1356_v63, %v1360_v0  ;;  %v1393_v35 = vrot.slane %v1391_v17, 4  ;;  %v1396_v36 = vrot.slane %v1394_v18, 5  ;;  %v1825_v39 = vor.u32 %v1879_v24, %v1824_v23 }
  0x5b   : > { %v1375_v14 = vsel %vm2069_vm4, %v1370_v1, %v1374_v2  ;;  %v1410_v29 = vunpack.c.l.b16 %v1361_v13  ;;  %v1023_v42 = vor.u32 %v1022_v26, %v1019_v25  ;;  %v1037_v44 = vor.u32 %v1036_v28, %v1033_v27  ;;  %v1799_v2 = vld [vmem:[%s2038_s9 + $0x38] sm:$0xf] }
  0x5c   : > { %v1411_v30 = vunpack.c.l.b16 %v1375_v14  ;;  %v1800_v10 = vor.u32 %v1876_v3, %v1799_v2 }
  0x5d   : > { %v1038_v54 = vrot.slane %v1037_v44, 4 }
  0x5e   : > { %v1416_v47 = vpack.c.b16 %v1411_v30, %v1410_v29 }
  0x64   : > { %1772 = vmatmul.msk.bf16.vlgmr.msra.gmra.mxu1 %vm445_vm1, %v1054_v56  ;;  %v1415_v56 = vpack.c.b16 %v1409_v41, %v1408_v40  ;;  %v1847_v40 = vld [vmem:[%s2038_s9 + $0x3c] sm:$0x1]  ;;  %v1849_v41 = vld [vmem:[%s2038_s9 + $0x44] sm:$0x1] }
  0x65   : > { %1801 = vmatmul.msk.bf16.vlgmr.msra.gmra.mxu2 %vm445_vm1, %v1788_v59  ;;  %1830 = vmatmul.msk.bf16.vlgmr.msra.gmra.mxu3 %vm445_vm1, %v1817_v60  ;;  %v996_v59 = vrot.slane %v995_v48, 4  ;;  %v1000_v60 = vrot.slane %v998_v49, 5  ;;  %v1383_v48 = vor.u32 %v1382_v34, %v1379_v33  ;;  %v1386_v49 = vshll.u32 %v1847_v40, 16 }
  0x66   : > { %1851 = vmatmul.msk.bf16.vlgmr.msra.gmra.mxu0 %vm445_vm1, %v1414_v61  ;;  %v1010_v61 = vrot.slane %v1009_v50, 4  ;;  %v1397_v50 = vor.u32 %v1396_v36, %v1393_v35  ;;  %v1400_v51 = vshll.u32 %v1849_v41, 16 }
  0x67   : > { %v1001_v5 = vsel %vm2069_vm4, %v996_v59, %v1000_v60  ;;  %v1388_v57 = vrot.slane %v1386_v49, 5 }
  0x68   : > { %v1015_v6 = vsel %vm2069_vm4, %v1010_v61, %v1014_v62  ;;  %v1050_v19 = vunpack.c.l.b16 %v1001_v5  ;;  %v1398_v58 = vrot.slane %v1397_v50, 4  ;;  %v1402_v59 = vrot.slane %v1400_v51, 5  ;;  %v1880_v5 = vld [vmem:[%s2026_s21 + $0x3c] sm:$0xf0] }
  0x69   : > { %v1051_v20 = vunpack.c.l.b16 %v1015_v6  ;;  %v1829_v11 = vor.u32 %v1880_v5, %v1828_v4  ;;  %v2298_v4 = vld [vmem:[%s2380_s5] ss:$0 sm:$0xff] }
  0x6a   : > { %v1403_v63 = vsel %vm2069_vm4, %v1398_v58, %v1402_v59 }
  0x6b   : > { %v1056_v37 = vpack.c.b16 %v1051_v20, %v1050_v19  ;;  %v1413_v7 = vunpack.c.l.b16 %v1403_v63 }
  0x74   : > { %1773 = vmatmul.msk.bf16.gmra.mxu1 %vm445_vm1, %v1055_v45  ;;  %v1040_v45 = vshll.u32 %v931_v32, 16 }
  0x75   : > { %1802 = vmatmul.msk.bf16.gmra.mxu2 %vm445_vm1, %v1792_v52  ;;  %1831 = vmatmul.msk.bf16.gmra.mxu3 %vm445_vm1, %v1821_v53  ;;  %v1024_v52 = vrot.slane %v1023_v42, 4  ;;  %v1028_v53 = vrot.slane %v1026_v43, 5 }
  0x76   : > { %1852 = vmatmul.msk.bf16.gmra.mxu0 %vm445_vm1, %v1415_v56  ;;  %v1042_v55 = vrot.slane %v1040_v45, 5  ;;  %v1384_v56 = vrot.slane %v1383_v48, 4 }
  0x77   : > { %v1029_v60 = vsel %vm2069_vm4, %v1024_v52, %v1028_v53 }
  0x78   : > { %v1043_v61 = vsel %vm2069_vm4, %v1038_v54, %v1042_v55  ;;  %v1389_v62 = vsel %vm2069_vm4, %v1384_v56, %v1388_v57  ;;  %v1052_v0 = vunpack.c.l.b16 %v1029_v60 }
  0x79   : > { %v1053_v1 = vunpack.c.l.b16 %v1043_v61  ;;  %v1412_v6 = vunpack.c.l.b16 %v1389_v62 }
  0x7b   : > { %v1057_v8 = vpack.c.b16 %v1053_v1, %v1052_v0  ;;  %v1417_v12 = vpack.c.b16 %v1413_v7, %v1412_v6 }
  0x84   : > { %1774 = vmatmul.msk.bf16.gmra.mxu1 %vm445_vm1, %v1056_v37 }
  0x85   : > { %1803 = vmatmul.msk.bf16.gmra.mxu2 %vm445_vm1, %v1796_v38  ;;  %1832 = vmatmul.msk.bf16.gmra.mxu3 %vm445_vm1, %v1825_v39 }
  0x86   : > { %1853 = vmatmul.msk.bf16.gmra.mxu0 %vm445_vm1, %v1416_v47 }
  0x91   : > { %v2239_v9 = vpop.f32.mrf.mxu1 }
  0x93   : > { %v471_v13 = vpop.f32.mrf.mxu0 }
  0x94   : > { %1775 = vmatmul.msk.bf16.gmra.mxu1 %vm445_vm1, %v1057_v8  ;;  %v2303_v8 = vld [vmem:[%s2381_s6] ss:$0 sm:$0xff] }
  0x95   : > { %1804 = vmatmul.msk.bf16.gmra.mxu2 %vm445_vm1, %v1800_v10  ;;  %1833 = vmatmul.msk.bf16.gmra.mxu3 %vm445_vm1, %v1829_v11 }
  0x96   : > { %1854 = vmatmul.msk.bf16.gmra.mxu0 %vm445_vm1, %v1417_v12 }
  0x98   : > { %v2245_v46 = vpop.f32.mrf.mxu2  ;;  %v2247_v14 = vpop.f32.mrf.mxu3 }
  0x99   : > { %v2249_v15 = vpop.f32.mrf.mxu1 }
  0x9b   : > { %v473_v16 = vpop.f32.mrf.mxu0 }
  0xa0   : > { %v2251_v17 = vpop.f32.mrf.mxu2  ;;  %v2253_v18 = vpop.f32.mrf.mxu3 }
  0xa1   : > { %v535_v19 = vpop.f32.mrf.mxu1 }
  0xa2   : > { %v536_v49 = vadd.f32 %v535_v19, %v471_v13 }
  0xa3   : > { %v888_v20 = vpop.f32.mrf.mxu0 }
  0xa8   : > { %v724_v21 = vpop.f32.mrf.mxu2  ;;  %v806_v22 = vpop.f32.mrf.mxu3 }
  0xa9   : > { %v537_v23 = vpop.f32.mrf.mxu1  ;;  %v744_v51 = vadd.f32 %v724_v21, %v536_v49 }
  0xaa   : > { %v538_v56 = vadd.f32 %v537_v23, %v473_v16 }
  0xab   : > { %v890_v24 = vpop.f32.mrf.mxu0  ;;  %v826_v54 = vadd.f32 %v806_v22, %v744_v51 }
  0xad   : > { %v908_v59 = vadd.f32 %v888_v20, %v826_v54 }
  0xb0   : > { %v726_v25 = vpop.f32.mrf.mxu2  ;;  %v808_v26 = vpop.f32.mrf.mxu3 }
  0xb1   : > { %v540_v27 = vpop.f32.mrf.mxu1  ;;  %v745_v58 = vadd.f32 %v726_v25, %v538_v56 }
  0xb2   : > { %v541_v2 = vadd.f32 %v540_v27, %v2239_v9 }
  0xb3   : > { %v2255_v28 = vpop.f32.mrf.mxu0  ;;  %v827_v63 = vadd.f32 %v808_v26, %v745_v58 }
  0xb5   : > { %v909_v10 = vadd.f32 %v890_v24, %v827_v63 }
  0xb8   : > { %v729_v29 = vpop.f32.mrf.mxu2  ;;  %v811_v30 = vpop.f32.mrf.mxu3 }
  0xb9   : > { %v542_v31 = vpop.f32.mrf.mxu1  ;;  %v746_v6 = vadd.f32 %v729_v29, %v541_v2 }
  0xba   : > { %v543_v22 = vadd.f32 %v542_v31, %v2249_v15 }
  0xbb   : > { %v2257_v32 = vpop.f32.mrf.mxu0  ;;  %v828_v16 = vadd.f32 %v811_v30, %v746_v6 }
  0xbd   : > { %v910_v30 = vadd.f32 %v2255_v28, %v828_v16 }
  0xc0   : > { %v731_v33 = vpop.f32.mrf.mxu2  ;;  %v2259_v34 = vpop.f32.mrf.mxu3 }
  0xc1   : > { %v2261_v35 = vpop.f32.mrf.mxu1  ;;  %v747_v24 = vadd.f32 %v731_v33, %v543_v22 }
  0xc2   : > { %v546_v33 = vadd.f32 %v2261_v35, %v2245_v46 }
  0xc3   : > { %v2263_v36 = vpop.f32.mrf.mxu0  ;;  %v829_v54 = vadd.f32 %v2259_v34, %v747_v24 }
  0xc5   : > { %v911_v63 = vadd.f32 %v2257_v32, %v829_v54 }
  0xc8   : > { %v2265_v37 = vpop.f32.mrf.mxu2  ;;  %v2267_v38 = vpop.f32.mrf.mxu3 }
  0xc9   : > { %v2269_v39 = vpop.f32.mrf.mxu1 }
  0xcb   : > { %v2271_v40 = vpop.f32.mrf.mxu0 }
  0xd0   : > { %v2273_v41 = vpop.f32.mrf.mxu2  ;;  %v2275_v42 = vpop.f32.mrf.mxu3 }
  0xd1   : > { %v2277_v43 = vpop.f32.mrf.mxu1 }
  0xd3   : > { %v2279_v44 = vpop.f32.mrf.mxu0 }
  0xd8   : > { %v2281_v45 = vpop.f32.mrf.mxu2  ;;  %v2283_v47 = vpop.f32.mrf.mxu3 }
  0xd9   : > { %v2285_v48 = vpop.f32.mrf.mxu1 }
  0xdb   : > { %v2287_v50 = vpop.f32.mrf.mxu0 }
  0xe0   : > { %v2289_v52 = vpop.f32.mrf.mxu2  ;;  %v2291_v53 = vpop.f32.mrf.mxu3 }
  0xe1   : > { %v1082_v55 = vpop.f32.mrf.mxu1 }
  0xe2   : > { %v1102_v60 = vadd.f32 %v1082_v55, %v908_v59 }
  0xe3   : > { %v1442_v57 = vpop.f32.mrf.mxu0 }
  0xe8   : > { %v1165_v61 = vpop.f32.mrf.mxu2  ;;  %v1248_v62 = vpop.f32.mrf.mxu3 }
  0xe9   : > { %v1185_v0 = vadd.f32 %v1165_v61, %v1102_v60  ;;  %v1084_v1 = vpop.f32.mrf.mxu1  ;;  %v748_v60 = vadd.f32 %v2265_v37, %v546_v33  ;;  %v548_v37 = vadd.f32 %v2269_v39, %v2251_v17 }
  0xea   : > { %v1103_v12 = vadd.f32 %v1084_v1, %v909_v10 }
  0xeb   : > { %v1268_v3 = vadd.f32 %v1248_v62, %v1185_v0  ;;  %v1444_v5 = vpop.f32.mrf.mxu0  ;;  %v749_v32 = vadd.f32 %v2273_v41, %v548_v37  ;;  %v551_v41 = vadd.f32 %v2277_v43, %v2247_v14 }
  0xed   : > { %v1462_v7 = vadd.f32 %v1442_v57, %v1268_v3  ;;  %v830_v3 = vadd.f32 %v2267_v38, %v748_v60 }
  0xef   : > { %v1474_v11 = vmul.f32 %v2298_v4, %v1462_v7 }
  0xf0   : > { %v1167_v9 = vpop.f32.mrf.mxu2  ;;  %v1250_v13 = vpop.f32.mrf.mxu3 }
  0xf1   : > { %v1486_v19 = vadd.f32 %v2303_v8, %v1474_v11  ;;  %v1186_v20 = vadd.f32 %v1167_v9, %v1103_v12  ;;  %v1087_v21 = vpop.f32.mrf.mxu1  ;;  %v912_v12 = vadd.f32 %v2263_v36, %v830_v3 }
  0xf2   : > { %v1104_v15 = vadd.f32 %v1087_v21, %v910_v30 }
  0xf3   : > { %v1494_v23 = vmax.f32 %v1486_v19, 0.0  ;;  %v1269_v25 = vadd.f32 %v1250_v13, %v1186_v20  ;;  %v1447_v26 = vpop.f32.mrf.mxu0  ;;  %v831_v20 = vadd.f32 %v2275_v42, %v749_v32 }
  0xf5   : > { %v1502_v27 = vpack.c.bf16 %v1494_v23, %v1494_v23  ;;  %v1463_v29 = vadd.f32 %v1444_v5, %v1269_v25  ;;  %v750_v23 = vadd.f32 %v2281_v45, %v551_v41  ;;  %v913_v24 = vadd.f32 %v2271_v40, %v831_v20 }
  0xf6   : > { %v553_v45 = vadd.f32 %v2285_v48, %v2253_v18 }
  0xf7   : > { %1511 = vst.msk [vmem:[%s2311_s29] sm:$0xf] %vm1510_vm5, %v1502_v27  ;;  %v1475_v49 = vmul.f32 %v2298_v4, %v1463_v29 }
  0xf8   : > { %v1170_v31 = vpop.f32.mrf.mxu2  ;;  %v1253_v51 = vpop.f32.mrf.mxu3  ;;  %v751_v54 = vadd.f32 %v2289_v52, %v553_v45 }
  0xf9   : > { %v1487_v55 = vadd.f32 %v2303_v8, %v1475_v49  ;;  %v1187_v56 = vadd.f32 %v1170_v31, %v1104_v15  ;;  %v1089_v57 = vpop.f32.mrf.mxu1  ;;  %v832_v15 = vadd.f32 %v2283_v47, %v750_v23 }
  0xfa   : > { %v1105_v0 = vadd.f32 %v1089_v57, %v911_v63 }
  0xfb   : > { %v1495_v58 = vmax.f32 %v1487_v55, 0.0  ;;  %v1270_v59 = vadd.f32 %v1253_v51, %v1187_v56  ;;  %v1449_v28 = vpop.f32.mrf.mxu0  ;;  %v914_v57 = vadd.f32 %v2279_v44, %v832_v15 }
  0xfd   : > { %v1503_v61 = vpack.c.bf16 %v1495_v58, %v1495_v58  ;;  %v1464_v62 = vadd.f32 %v1447_v26, %v1270_v59 }
  0xff   : > { %1512 = vst.msk [vmem:[%s2311_s29 + $0x4] sm:$0xf] %vm1510_vm5, %v1503_v61  ;;  %v1476_v34 = vmul.f32 %v2298_v4, %v1464_v62 }
 0x100   : > { %v1172_v1 = vpop.f32.mrf.mxu2  ;;  %v1255_v2 = vpop.f32.mrf.mxu3 }
 0x101   : > { %v1488_v46 = vadd.f32 %v2303_v8, %v1476_v34  ;;  %v1188_v35 = vadd.f32 %v1172_v1, %v1105_v0  ;;  %v1092_v5 = vpop.f32.mrf.mxu1 }
 0x102   : > { %v1106_v13 = vadd.f32 %v1092_v5, %v912_v12 }
 0x103   : > { %v1496_v6 = vmax.f32 %v1488_v46, 0.0  ;;  %v1271_v7 = vadd.f32 %v1255_v2, %v1188_v35  ;;  %v1452_v9 = vpop.f32.mrf.mxu0 }
 0x105   : > { %v1504_v10 = vpack.c.bf16 %v1496_v6, %v1496_v6  ;;  %v1465_v11 = vadd.f32 %v1449_v28, %v1271_v7  ;;  %v833_v28 = vadd.f32 %v2291_v53, %v751_v54 }
 0x107   : > { %1513 = vst.msk [vmem:[%s2311_s29 + $0x8] sm:$0xf] %vm1510_vm5, %v1504_v10  ;;  %v1477_v38 = vmul.f32 %v2298_v4, %v1465_v11  ;;  %v915_v34 = vadd.f32 %v2287_v50, %v833_v28 }
 0x108   : > { %v1175_v16 = vpop.f32.mrf.mxu2  ;;  %v1258_v19 = vpop.f32.mrf.mxu3 }
 0x109   : > { %v1489_v17 = vadd.f32 %v2303_v8, %v1477_v38  ;;  %v1189_v39 = vadd.f32 %v1175_v16, %v1106_v13  ;;  %v1094_v21 = vpop.f32.mrf.mxu1 }
 0x10a   : > { %v1107_v42 = vadd.f32 %v1094_v21, %v913_v24 }
 0x10b   : > { %v1497_v22 = vmax.f32 %v1489_v17, 0.0  ;;  %v1272_v36 = vadd.f32 %v1258_v19, %v1189_v39  ;;  %v1454_v29 = vpop.f32.mrf.mxu0 }
 0x10d   : > { %v1505_v25 = vpack.c.bf16 %v1497_v22, %v1497_v22  ;;  %v1466_v26 = vadd.f32 %v1452_v9, %v1272_v36 }
 0x10f   : > { %1514 = vst.msk [vmem:[%s2311_s29 + $0xc] sm:$0xf] %vm1510_vm5, %v1505_v25  ;;  %v1478_v27 = vmul.f32 %v2298_v4, %v1466_v26 }
 0x110   : > { %v1177_v30 = vpop.f32.mrf.mxu2  ;;  %v1260_v49 = vpop.f32.mrf.mxu3 }
 0x111   : > { %v1490_v14 = vadd.f32 %v2303_v8, %v1478_v27  ;;  %v1190_v43 = vadd.f32 %v1177_v30, %v1107_v42  ;;  %v1097_v31 = vpop.f32.mrf.mxu1 }
 0x112   : > { %v1108_v33 = vadd.f32 %v1097_v31, %v914_v57 }
 0x113   : > { %v1498_v51 = vmax.f32 %v1490_v14, 0.0  ;;  %v1273_v40 = vadd.f32 %v1260_v49, %v1190_v43  ;;  %v1457_v60 = vpop.f32.mrf.mxu0 }
 0x115   : > { %v1506_v55 = vpack.c.bf16 %v1498_v51, %v1498_v51  ;;  %v1467_v56 = vadd.f32 %v1454_v29, %v1273_v40 }
 0x117   : > { %1515 = vst.msk [vmem:[%s2311_s29 + $0x10] sm:$0xf] %vm1510_vm5, %v1506_v55  ;;  %v1479_v47 = vmul.f32 %v2298_v4, %v1467_v56 }
 0x118   : > { %v1180_v58 = vpop.f32.mrf.mxu2  ;;  %v1263_v59 = vpop.f32.mrf.mxu3 }
 0x119   : > { %v1491_v18 = vadd.f32 %v2303_v8, %v1479_v47  ;;  %v1191_v48 = vadd.f32 %v1180_v58, %v1108_v33  ;;  %v1099_v62 = vpop.f32.mrf.mxu1 }
 0x11a   : > { %v1109_v1 = vadd.f32 %v1099_v62, %v915_v34 }
 0x11b   : > { %v1499_v61 = vmax.f32 %v1491_v18, 0.0  ;;  %v1274_v52 = vadd.f32 %v1263_v59, %v1191_v48  ;;  %v1459_v37 = vpop.f32.mrf.mxu0 }
 0x11d   : > { %v1507_v63 = vpack.c.bf16 %v1499_v61, %v1499_v61  ;;  %v1468_v44 = vadd.f32 %v1457_v60, %v1274_v52 }
 0x11f   : > { %1516 = vst.msk [vmem:[%s2311_s29 + $0x14] sm:$0xf] %vm1510_vm5, %v1507_v63  ;;  %v1480_v0 = vmul.f32 %v2298_v4, %v1468_v44 }
 0x120   : > { %v1182_v2 = vpop.f32.mrf.mxu2  ;;  %v1265_v46 = vpop.f32.mrf.mxu3 }
 0x121   : > { %v1492_v53 = vadd.f32 %v2303_v8, %v1480_v0  ;;  %v1192_v3 = vadd.f32 %v1182_v2, %v1109_v1 }
 0x123   : > { %v1500_v35 = vmax.f32 %v1492_v53, 0.0  ;;  %v1275_v5 = vadd.f32 %v1265_v46, %v1192_v3 }
 0x125   : > { %v1508_v6 = vpack.c.bf16 %v1500_v35, %v1500_v35  ;;  %v1469_v7 = vadd.f32 %v1459_v37, %v1275_v5 }
 0x127   : > { %1517 = vst.msk [vmem:[%s2311_s29 + $0x18] sm:$0xf] %vm1510_vm5, %v1508_v6  ;;  %v1481_v50 = vmul.f32 %v2298_v4, %v1469_v7 }
 0x129   : > { %v1493_v32 = vadd.f32 %v2303_v8, %v1481_v50 }
 0x12b   : > { %v1501_v10 = vmax.f32 %v1493_v32, 0.0 }
 0x12d   : > { %v1509_v11 = vpack.c.bf16 %v1501_v10, %v1501_v10 }
 0x12f   : > { %1518 = vst.msk [vmem:[%s2311_s29 + $0x1c] sm:$0xf] %vm1510_vm5, %v1509_v11 }
 0x130 PF: > { %s17_s26 = sadd.s32 1, %s1933_s26   ;;  %s2385_s24 = smov %s1929_s25 }
 0x131   : > { %p14_p6 = scmp.ge.s32.totalorder %s17_s26, 4   ;;  %s2386_s25 = smov %s2388_s27 }
 0x133   :  { %16 = sbr.rel (!%p14_p6) target bundleno = 2 (0x2), region = 106 }

// kernel: basic_block_forward.3
= control target key start
LH: loop header
LB: loop body
LE: loop exit
PB: predicated region body
PF: predicated region fallthrough
CT: control target
= control target key end

     0   :  { %s2274_s27 = smov 0   ;;  %s2276_s28 = smov 0   ;;  %s2820_s0 = inlined_call_operand.vmem [shape: bf16[2,10,10,8], index: 0, kind: input, shape index: {}]   ;;  %s2821_s1 = inlined_call_operand.vmem [shape: bf16[9,8,8], index: 1, kind: input, shape index: {}]   ;;  %s2822_s2 = inlined_call_operand.vmem [shape: f32[1,8], index: 2, kind: input, shape index: {}]   ;;  %s2823_s3 = inlined_call_operand.vmem [shape: f32[1,8], index: 3, kind: input, shape index: {}]   ;;  %s2824_s4 = inlined_call_operand.vmem [shape: bf16[128,4], index: 4, kind: input, shape index: {}]   ;;  %s2825_s5 = inlined_call_operand.vmem [shape: bf16[4,8], index: 5, kind: input, shape index: {}]   ;;  %s2826_s6 = inlined_call_operand.vmem [shape: f32[1,8], index: 6, kind: input, shape index: {}]   ;;  %s2827_s7 = inlined_call_operand.vmem [shape: f32[1,8], index: 7, kind: input, shape index: {}]   ;;  %s2828_s8 = inlined_call_operand.vmem [shape: bf16[128,8], index: 8, kind: output, shape index: {}]  }
   0x1   :  { %s2278_s29 = smov 0  }
   0x2 LB: > { %s30_s30 = sadd.s32 1, %s2223_s28  ;;  %p1950_p0 = scmp.ge.s32.totalorder %s2227_s29, 1  ;;  %s2227_s29 = sphi %s2278_s29, %s18_s29   ;;  %s2223_s28 = sphi %s2276_s28, %s2834_s28   ;;  %s2219_s27 = sphi %s2274_s27, %s2833_s27  }
   0x3   : > { %p32_p1 = scmp.ge.s32.totalorder %s30_s30, 2  ;;  %p337_p2 = scmp.lt.s32.totalorder %s2227_s29, 3 }
   0x5   : > { %s2836_s30 = smov (%p32_p1, %s30_s30), 0  ;;  %p338_p3 = pnand %p1950_p0, %p337_p2 }
   0x6   : > { %p399_p4 = scmp.lt.s32.totalorder (!%p338_p3), %s2219_s27, 1  ;;  %s1952_s16 = sshll.u32 (!%p338_p3), %s2219_s27, 3 }
   0x7   : > { %341 = sbr.rel (%p338_p3) target bundleno = 336 (0x150), region = 52  ;;  %p415_p5 = scmp.lt.s32.totalorder (!%p338_p3), %s1952_s16, 15 }
   0xc   : > { %v448_v0 = vld [vmem:[%s2821_s1] sm:$0xf]  ;;  %vm599_vm0 = vcmask 1043456   ;;  %v1956_v2 = vld [vmem:[%s2821_s1 + $0x4] sm:$0xf]  ;;  %s400_s13 = scalar_select %p399_p4, %s2219_s27, 1 }
   0xd   : > { %v665_v1 = vsel %vm599_vm0, %v448_v0, 0  ;;  %v601_v3 = vsel %vm599_vm0, %v1956_v2, 0  ;;  %v1989_v4 = vld [vmem:[%s2821_s1 + $0x8] sm:$0xf]  ;;  %vm457_vm1 = vsmask.f32 3328 }
   0xe   : > { %2175 = vmatpush.bf16.msra.mxu3 %v665_v1  ;;  %674 = vmatpush.bf16.msra.mxu1 %v665_v1  ;;  %v782_v5 = vsel %vm599_vm0, %v1989_v4, 0  ;;  %v2002_v6 = vld [vmem:[%s2821_s1 + $0xc] sm:$0xf]  ;;  %v2039_v7 = vld [vmem:[%s2821_s1 + $0x10] sm:$0xf]  ;;  %s2176_s20 = smul.u32 80, %s400_s13 }
   0xf   : > { %2174 = vmatpush.bf16.msra.mxu2 %v601_v3  ;;  %610 = vmatpush.bf16.msra.mxu0 %v601_v3  ;;  %v865_v8 = vsel %vm599_vm0, %v2002_v6, 0  ;;  %v1059_v9 = vsel %vm599_vm0, %v2039_v7, 0  ;;  %v2060_v10 = vld [vmem:[%s2821_s1 + $0x14] sm:$0xf]  ;;  %vm586_vm2 = vcmask 64512   ;;  %vm720_vm5 = vcmask 1042432  }
  0x10   : > { %v1181_v11 = vsel %vm599_vm0, %v2060_v10, 0  ;;  %s2323_s25 = scalar_lea.vmem %s2820_s0, %s2176_s20  ;;  %vm458_vm3 = vsmask.f32 7440  ;;  %vm721_vm6 = vcmask 1046532   ;;  %vm1685_vm8 = vcmask 1041408   ;;  %s2838_s16 = smov (!%p415_p5, %s1952_s16), 15 }
  0x11   : > { %v1971_v12 = vld [vmem:[%s2323_s25 + $0x20] sm:$0xf]  ;;  %v2160_v13 = vld [vmem:[%s2323_s25 + $0x24] sm:$0xf0]  ;;  %v2330_v17 = vld [vmem:[%s2323_s25 + $0x24] sm:$0x1] }
  0x12   : > { %874 = vmatpush.bf16.msrb.mxu3 %v865_v8  ;;  %1190 = vmatpush.bf16.msrb.mxu1 %v1181_v11  ;;  %v444_v14 = vld [vmem:[%s2323_s25 + $0x20] sm:$0xf]  ;;  %v1972_v15 = vor.u32 %v2160_v13, %v1971_v12  ;;  %v445_v16 = vld [vmem:[%s2323_s25 + $0x28] sm:$0xf]  ;;  %v2333_v18 = vld [vmem:[%s2323_s25 + $0x2c] sm:$0x1] }
  0x13   : > { %791 = vmatpush.bf16.msrb.mxu2 %v782_v5  ;;  %1068 = vmatpush.bf16.msrb.mxu0 %v1059_v9  ;;  %v517_v19 = vshrl.u32 %v444_v14, 16  ;;  %v520_v20 = vshll.u32 %v444_v14, 16  ;;  %v526_v21 = vshll.u32 %v2330_v17, 16  ;;  %v531_v22 = vshrl.u32 %v445_v16, 16  ;;  %v440_v23 = vld [vmem:[%s2323_s25] sm:$0xf]  ;;  %vm2351_vm4 = vmor %vm457_vm1, %vm458_vm3 }
  0x14   : > { %1979 = vmatmul.msk.bf16.vlgmr.msra.gmra.mxu3 %vm586_vm2, %v1972_v15  ;;  %v534_v24 = vshll.u32 %v445_v16, 16  ;;  %v540_v25 = vshll.u32 %v2333_v18, 16  ;;  %v441_v26 = vld [vmem:[%s2323_s25 + $0x8] sm:$0xf]  ;;  %v2341_v27 = vld [vmem:[%s2323_s25 + $0x4] sm:$0x1]  ;;  %vm2429_vm7 = vmor %vm720_vm5, %vm721_vm6 }
  0x15   : > { %v519_v28 = vrot.slane %v517_v19, 4  ;;  %v522_v29 = vrot.slane %v520_v20, 5  ;;  %v528_v30 = vrot.slane %v526_v21, 5  ;;  %v533_v31 = vrot.slane %v531_v22, 4  ;;  %v2344_v32 = vld [vmem:[%s2323_s25 + $0xc] sm:$0x1] }
  0x16   : > { %v536_v33 = vrot.slane %v534_v24, 5  ;;  %v542_v34 = vrot.slane %v540_v25, 5  ;;  %v461_v35 = vshrl.u32 %v440_v23, 16  ;;  %v464_v36 = vshll.u32 %v440_v23, 16  ;;  %v1963_v37 = vld [vmem:[%s2323_s25] sm:$0xf] }
  0x17   : > { %v523_v38 = vor.u32 %v522_v29, %v519_v28  ;;  %v470_v39 = vshll.u32 %v2341_v27, 16  ;;  %v475_v40 = vshrl.u32 %v441_v26, 16  ;;  %v478_v41 = vshll.u32 %v441_v26, 16  ;;  %v2158_v42 = vld [vmem:[%s2323_s25 + $0x4] sm:$0xf0]  ;;  %s1953_s27 = sshll.u32 %s2838_s16, 2 }
  0x18   : > { %v537_v44 = vor.u32 %v536_v33, %v533_v31  ;;  %v463_v45 = vrot.slane %v461_v35, 4  ;;  %v466_v46 = vrot.slane %v464_v36, 5  ;;  %v484_v47 = vshll.u32 %v2344_v32, 16  ;;  %v1975_v48 = vld [vmem:[%s2323_s25 + $0x30] sm:$0xf]  ;;  %s2585_s19 = scalar_lea.vmem %s2824_s4, %s1953_s27  ;;  %s2745_s12 = scalar_lea.vmem %s2828_s8, %s1953_s27 }
  0x19   : > { %v524_v49 = vrot.slane %v523_v38, 4  ;;  %v477_v50 = vrot.slane %v475_v40, 4  ;;  %v480_v51 = vrot.slane %v478_v41, 5  ;;  %v2161_v52 = vld [vmem:[%s2323_s25 + $0x34] sm:$0xf0]  ;;  %v472_v55 = vrot.slane %v470_v39, 5 }
  0x1a   : > { %v538_v53 = vrot.slane %v537_v44, 4  ;;  %v467_v54 = vor.u32 %v466_v46, %v463_v45  ;;  %v446_v56 = vld [vmem:[%s2323_s25 + $0x30] sm:$0xf]  ;;  %v486_v59 = vrot.slane %v484_v47, 5  ;;  %v1964_v60 = vor.u32 %v2158_v42, %v1963_v37  ;;  %v447_v61 = vld [vmem:[%s2323_s25 + $0x38] sm:$0xf] }
  0x1b   : > { %v529_v57 = vsel %vm2351_vm4, %v524_v49, %v528_v30  ;;  %v481_v58 = vor.u32 %v480_v51, %v477_v50  ;;  %v2363_v62 = vld [vmem:[%s2323_s25 + $0x34] sm:$0x1]  ;;  %v1976_v2 = vor.u32 %v2161_v52, %v1975_v48  ;;  %v2369_v5 = vld [vmem:[%s2323_s25 + $0x3c] sm:$0x1]  ;;  %v545_v6 = vshrl.u32 %v446_v56, 16 }
  0x1c   : > { %v543_v63 = vsel %vm2351_vm4, %v538_v53, %v542_v34  ;;  %v578_v0 = vunpack.c.l.b16 %v529_v57  ;;  %v468_v1 = vrot.slane %v467_v54, 4  ;;  %1977 = vmatmul.msk.bf16.vlgmr.msra.gmra.mxu1 %vm586_vm2, %v1964_v60  ;;  %v548_v7 = vshll.u32 %v446_v56, 16  ;;  %v442_v12 = vld [vmem:[%s2323_s25 + $0x10] sm:$0xf]  ;;  %v443_v19 = vld [vmem:[%s2323_s25 + $0x18] sm:$0xf] }
  0x1d   : > { %v579_v3 = vunpack.c.l.b16 %v543_v63  ;;  %v482_v4 = vrot.slane %v481_v58, 4  ;;  %v554_v9 = vshll.u32 %v2363_v62, 16  ;;  %v559_v10 = vshrl.u32 %v447_v61, 16  ;;  %v2379_v20 = vld [vmem:[%s2323_s25 + $0x14] sm:$0x1] }
  0x1e   : > { %v473_v8 = vsel %vm2351_vm4, %v468_v1, %v472_v55  ;;  %v562_v11 = vshll.u32 %v447_v61, 16  ;;  %v547_v16 = vrot.slane %v545_v6, 4  ;;  %v550_v22 = vrot.slane %v548_v7, 5  ;;  %v2384_v33 = vld [vmem:[%s2323_s25 + $0x1c] sm:$0x1] }
  0x1f   : > { %v584_v13 = vpack.c.b16 %v579_v3, %v578_v0  ;;  %v487_v14 = vsel %vm2351_vm4, %v482_v4, %v486_v59  ;;  %v574_v15 = vunpack.c.l.b16 %v473_v8  ;;  %v556_v23 = vrot.slane %v554_v9, 5  ;;  %v1967_v44 = vld [vmem:[%s2323_s25 + $0x10] sm:$0xf]  ;;  %v2159_v49 = vld [vmem:[%s2323_s25 + $0x14] sm:$0xf0] }
  0x20   : > { %v575_v21 = vunpack.c.l.b16 %v487_v14  ;;  %v561_v24 = vrot.slane %v559_v10, 4  ;;  %v564_v25 = vrot.slane %v562_v11, 5  ;;  %v568_v26 = vshll.u32 %v2369_v5, 16  ;;  %v2073_v52 = vld [vmem:[%s2821_s1 + $0x18] sm:$0xf] }
  0x21   : > { %1959 = vmatmul.msk.bf16.vlgmr.msra.gmra.mxu2 %vm586_vm2, %v584_v13  ;;  %v489_v28 = vshrl.u32 %v442_v12, 16  ;;  %v492_v29 = vshll.u32 %v442_v12, 16  ;;  %v551_v31 = vor.u32 %v550_v22, %v547_v16  ;;  %v498_v34 = vshll.u32 %v2379_v20, 16  ;;  %v2023_v53 = vld [vmem:[%s2323_s25 + $0x8] sm:$0xf] }
  0x22   : > { %v582_v30 = vpack.c.b16 %v575_v21, %v574_v15  ;;  %v503_v35 = vshrl.u32 %v443_v19, 16  ;;  %v565_v36 = vor.u32 %v564_v25, %v561_v24  ;;  %v570_v37 = vrot.slane %v568_v26, 5  ;;  %v2402_v57 = vld [vmem:[%s2323_s25 + $0x8] sm:$0xf]  ;;  %v2162_v58 = vld [vmem:[%s2323_s25 + $0xc] sm:$0xf0] }
  0x23   : > { %v491_v38 = vrot.slane %v489_v28, 4  ;;  %v494_v39 = vrot.slane %v492_v29, 5  ;;  %v552_v40 = vrot.slane %v551_v31, 4  ;;  %v506_v42 = vshll.u32 %v443_v19, 16  ;;  %v2025_v3 = vld [vmem:[%s2323_s25 + $0x10] sm:$0xf] }
  0x24   : > { %1957 = vmatmul.msk.bf16.vlgmr.msra.gmra.mxu0 %vm586_vm2, %v582_v30  ;;  %1980 = vmatmul.msk.bf16.gmra.mxu3 %vm586_vm2, %v1976_v2  ;;  %v505_v41 = vrot.slane %v503_v35, 4  ;;  %v566_v45 = vrot.slane %v565_v36, 4  ;;  %v500_v47 = vrot.slane %v498_v34, 5  ;;  %v512_v48 = vshll.u32 %v2384_v33, 16  ;;  %v696_v2 = vld [vmem:[%s2323_s25] sm:$0xe] }
  0x25   : > { %v495_v46 = vor.u32 %v494_v39, %v491_v38  ;;  %v557_v50 = vsel %vm2351_vm4, %v552_v40, %v556_v23  ;;  %v508_v51 = vrot.slane %v506_v42, 5  ;;  %v725_v54 = vrot.slane %v2341_v27, 5  ;;  %v697_v9 = vld [vmem:[%s2323_s25 + $0x8] sm:$0xe]  ;;  %v2024_v10 = vld [vmem:[%s2323_s25 + $0xc] sm:$0x1] }
  0x26   : > { %v571_v55 = vsel %vm2351_vm4, %v566_v45, %v570_v37  ;;  %v580_v59 = vunpack.c.l.b16 %v557_v50  ;;  %v514_v61 = vrot.slane %v512_v48, 5  ;;  %v1968_v63 = vor.u32 %v2159_v49, %v1967_v44  ;;  %v2110_v14 = vld [vmem:[%s2821_s1 + $0x1c] sm:$0xf]  ;;  %v2026_v16 = vld [vmem:[%s2323_s25 + $0x14] sm:$0x1] }
  0x27   : > { %v496_v56 = vrot.slane %v495_v46, 4  ;;  %v509_v60 = vor.u32 %v508_v51, %v505_v41  ;;  %v581_v0 = vunpack.c.l.b16 %v571_v55  ;;  %v1264_v27 = vsel %vm599_vm0, %v2073_v52, 0  ;;  %v2044_v25 = vld [vmem:[%s2323_s25 + $0x8] sm:$0xe]  ;;  %v2045_v26 = vld [vmem:[%s2323_s25 + $0x10] sm:$0xe] }
  0x28   : > { %v921_v4 = vshrl.u32 %v2023_v53, 16  ;;  %v729_v6 = vrot.slane %v2344_v32, 5  ;;  %v2006_v8 = vor.u32 %v2162_v58, %v2402_v57  ;;  %1273 = vmatpush.bf16.msra.mxu2 %v1264_v27  ;;  %v924_v13 = vshll.u32 %v2023_v53, 16  ;;  %v2131_v34 = vld [vmem:[%s2821_s1 + $0x20] sm:$0xf] }
  0x29   : > { %v501_v1 = vsel %vm2351_vm4, %v496_v56, %v500_v47  ;;  %v510_v7 = vrot.slane %v509_v60, 4  ;;  %v1981_v32 = vrot.slane %v696_v2, 9  ;;  %v935_v19 = vshrl.u32 %v2025_v3, 16  ;;  %v1651_v47 = vld [vmem:[%s2825_s5] sm:$0x3] }
  0x2a   : > { %v576_v11 = vunpack.c.l.b16 %v501_v1  ;;  %v923_v12 = vrot.slane %v921_v4, 4  ;;  %v585_v21 = vpack.c.b16 %v581_v0, %v580_v59  ;;  %v926_v23 = vrot.slane %v924_v13, 5  ;;  %v2027_v58 = vld [vmem:[%s2323_s25 + $0x18] sm:$0xf]  ;;  %v2163_v1 = vld [vmem:[%s2323_s25 + $0x1c] sm:$0xf0] }
  0x2b   : > { %v515_v15 = vsel %vm2351_vm4, %v510_v7, %v514_v61  ;;  %v938_v24 = vshll.u32 %v2025_v3, 16  ;;  %v1982_v28 = vrot.slane %v697_v9, 9  ;;  %v930_v29 = vshll.u32 %v2024_v10, 16  ;;  %v2009_v0 = vld [vmem:[%s2323_s25 + $0x18] sm:$0xf] }
  0x2c   : > { %v577_v22 = vunpack.c.l.b16 %v515_v15  ;;  %1978 = vmatmul.msk.bf16.gmra.mxu1 %vm586_vm2, %v1968_v63  ;;  %v937_v30 = vrot.slane %v935_v19, 4  ;;  %v1458_v31 = vsel %vm599_vm0, %v2110_v14, 0  ;;  %v927_v36 = vor.u32 %v926_v23, %v923_v12  ;;  %v698_v4 = vld [vmem:[%s2323_s25 + $0x10] sm:$0xe]  ;;  %v2046_v13 = vld [vmem:[%s2323_s25 + $0x18] sm:$0xe] }
  0x2d   : > { %v940_v37 = vrot.slane %v938_v24, 5  ;;  %v944_v38 = vshll.u32 %v2026_v16, 16  ;;  %1467 = vmatpush.bf16.msra.mxu3 %v1458_v31  ;;  %v2052_v40 = vrot.slane %v2044_v25, 9  ;;  %v1124_v41 = vrot.slane %v2024_v10, 5  ;;  %v700_v10 = vld [vmem:[%s2323_s25 + $0x20] sm:$0xe] }
  0x2e   : > { %v583_v35 = vpack.c.b16 %v577_v22, %v576_v11  ;;  %v2053_v42 = vrot.slane %v2045_v26, 9  ;;  %v1128_v44 = vrot.slane %v2026_v16, 5  ;;  %v1580_v46 = vsel %vm599_vm0, %v2131_v34, 0  ;;  %v701_v14 = vld [vmem:[%s2323_s25 + $0x28] sm:$0xe] }
  0x2f   : > { %v941_v45 = vor.u32 %v940_v37, %v937_v30  ;;  %v1125_v48 = vsel %vm2429_vm7, %v2052_v40, %v1124_v41  ;;  %1589 = vmatpush.bf16.msra.mxu0 %v1580_v46  ;;  %v726_v50 = vsel %vm2429_vm7, %v1981_v32, %v725_v54  ;;  %v730_v51 = vsel %vm2429_vm7, %v1982_v28, %v729_v6  ;;  %v2029_v54 = vld [vmem:[%s2323_s25 + $0x20] sm:$0xf]  ;;  %v699_v16 = vld [vmem:[%s2323_s25 + $0x18] sm:$0xe]  ;;  %v2028_v23 = vld [vmem:[%s2323_s25 + $0x1c] sm:$0x1] }
  0x30   : > { %v1129_v49 = vsel %vm2429_vm7, %v2053_v42, %v1128_v44  ;;  %v932_v52 = vrot.slane %v930_v29, 5  ;;  %v928_v53 = vrot.slane %v927_v36, 4  ;;  %v946_v56 = vrot.slane %v944_v38, 5  ;;  %v2047_v22 = vld [vmem:[%s2323_s25 + $0x20] sm:$0xe] }
  0x31   : > { %1960 = vmatmul.msk.bf16.gmra.mxu2 %vm586_vm2, %v585_v21  ;;  %v942_v55 = vrot.slane %v941_v45, 4  ;;  %v1687_v57 = vsel %vm1685_vm8, %v1651_v47, 0  ;;  %v1156_v59 = vunpack.c.l.b16 %v1125_v48  ;;  %v1157_v60 = vunpack.c.l.b16 %v1129_v49  ;;  %v2030_v29 = vld [vmem:[%s2323_s25 + $0x24] sm:$0x1]  ;;  %v2121_v43 = vld [vmem:[%s2323_s25 + $0x40] sm:$0xe] }
  0x32   : > { %1696 = vmatpush.bf16.msra.mxu1 %v1687_v57  ;;  %v757_v61 = vunpack.c.l.b16 %v726_v50  ;;  %v758_v63 = vunpack.c.l.b16 %v730_v51  ;;  %v949_v2 = vshrl.u32 %v2027_v58, 16  ;;  %v933_v27 = vsel %vm2351_vm4, %v928_v53, %v932_v52  ;;  %v2031_v52 = vld [vmem:[%s2323_s25 + $0x28] sm:$0xf] }
  0x33   : > { %v947_v3 = vsel %vm2351_vm4, %v942_v55, %v946_v56  ;;  %v952_v6 = vshll.u32 %v2027_v58, 16  ;;  %v963_v7 = vshrl.u32 %v2029_v54, 16  ;;  %v966_v9 = vshll.u32 %v2029_v54, 16  ;;  %v2033_v58 = vld [vmem:[%s2323_s25 + $0x30] sm:$0xf] }
  0x34   : > { %1958 = vmatmul.msk.bf16.gmra.mxu0 %vm586_vm2, %v583_v35  ;;  %2019 = vmatmul.msk.bf16.vlgmr.msrb.gmra.mxu3 %vm586_vm2, %v2006_v8  ;;  %v1164_v8 = vpack.c.b16 %v1157_v60, %v1156_v59  ;;  %v765_v11 = vpack.c.b16 %v758_v63, %v757_v61  ;;  %v2010_v12 = vor.u32 %v2163_v1, %v2009_v0  ;;  %v1034_v15 = vunpack.c.l.b16 %v933_v27  ;;  %v702_v63 = vld [vmem:[%s2323_s25 + $0x30] sm:$0xe] }
  0x35   : > { %v1035_v32 = vunpack.c.l.b16 %v947_v3  ;;  %v1983_v19 = vrot.slane %v698_v4, 9  ;;  %v951_v21 = vrot.slane %v949_v2, 4  ;;  %v954_v24 = vrot.slane %v952_v6, 5  ;;  %v703_v2 = vld [vmem:[%s2323_s25 + $0x38] sm:$0xe] }
  0x36   : > { %v965_v25 = vrot.slane %v963_v7, 4  ;;  %v1985_v26 = vrot.slane %v700_v10, 9  ;;  %v741_v28 = vrot.slane %v2330_v17, 5  ;;  %v968_v30 = vrot.slane %v966_v9, 5 }
  0x37   : > { %v2054_v31 = vrot.slane %v2046_v13, 9  ;;  %v1132_v34 = vrot.slane %v2028_v23, 5  ;;  %v1986_v35 = vrot.slane %v701_v14, 9  ;;  %v2055_v36 = vrot.slane %v2047_v22, 9 }
  0x38   : > { %v1136_v37 = vrot.slane %v2030_v29, 5  ;;  %v742_v38 = vsel %vm2429_vm7, %v1985_v26, %v741_v28  ;;  %v745_v40 = vrot.slane %v2333_v18, 5  ;;  %v733_v41 = vrot.slane %v2379_v20, 5  ;;  %v2034_v28 = vld [vmem:[%s2323_s25 + $0x34] sm:$0x1] }
  0x39   : > { %v1984_v42 = vrot.slane %v699_v16, 9  ;;  %v737_v17 = vrot.slane %v2384_v33, 5  ;;  %v761_v44 = vunpack.c.l.b16 %v742_v38  ;;  %v1042_v45 = vpack.c.b16 %v1035_v32, %v1034_v15  ;;  %v2032_v15 = vld [vmem:[%s2323_s25 + $0x2c] sm:$0x1]  ;;  %v2048_v16 = vld [vmem:[%s2323_s25 + $0x28] sm:$0xe] }
  0x3a   : > { %v958_v46 = vshll.u32 %v2028_v23, 16  ;;  %v972_v47 = vshll.u32 %v2030_v29, 16  ;;  %v746_v48 = vsel %vm2429_vm7, %v1986_v35, %v745_v40  ;;  %v955_v49 = vor.u32 %v954_v24, %v951_v21  ;;  %v2049_v23 = vld [vmem:[%s2323_s25 + $0x30] sm:$0xe] }
  0x3b   : > { %v969_v50 = vor.u32 %v968_v30, %v965_v25  ;;  %v762_v51 = vunpack.c.l.b16 %v746_v48  ;;  %v1133_v18 = vsel %vm2429_vm7, %v2054_v31, %v1132_v34  ;;  %v1137_v20 = vsel %vm2429_vm7, %v2055_v36, %v1136_v37  ;;  %v2013_v30 = vld [vmem:[%s2323_s25 + $0x28] sm:$0xf]  ;;  %v2164_v31 = vld [vmem:[%s2323_s25 + $0x2c] sm:$0xf0] }
  0x3c   : > { %2061 = vmatmul.msk.bf16.vlgmr.msrb.gmra.mxu1 %vm586_vm2, %v1164_v8  ;;  %v734_v53 = vsel %vm2429_vm7, %v1983_v19, %v733_v41  ;;  %v738_v55 = vsel %vm2429_vm7, %v1984_v42, %v737_v17  ;;  %v960_v56 = vrot.slane %v958_v46, 5  ;;  %v974_v57 = vrot.slane %v972_v47, 5 }
  0x3d   : > { %v2478_v33 = vpack.c.b16 %v762_v51, %v761_v44  ;;  %v956_v59 = vrot.slane %v955_v49, 4  ;;  %v970_v60 = vrot.slane %v969_v50, 4  ;;  %v1158_v54 = vunpack.c.l.b16 %v1133_v18  ;;  %v2035_v18 = vld [vmem:[%s2323_s25 + $0x38] sm:$0xf] }
  0x3e   : > { %v1159_v61 = vunpack.c.l.b16 %v1137_v20  ;;  %v977_v0 = vshrl.u32 %v2031_v52, 16  ;;  %v980_v1 = vshll.u32 %v2031_v52, 16  ;;  %v1987_v27 = vrot.slane %v702_v63, 9  ;;  %v2037_v20 = vld [vmem:[%s2323_s25 + $0x40] sm:$0xf] }
  0x3f   : > { %v991_v3 = vshrl.u32 %v2033_v58, 16  ;;  %v994_v4 = vshll.u32 %v2033_v58, 16  ;;  %v749_v6 = vrot.slane %v2363_v62, 5  ;;  %v1988_v7 = vrot.slane %v703_v2, 9  ;;  %v2096_v58 = vld [vmem:[%s2323_s25 + $0x18] sm:$0xf] }
  0x40   : > { %v759_v8 = vunpack.c.l.b16 %v734_v53  ;;  %v760_v9 = vunpack.c.l.b16 %v738_v55  ;;  %v753_v10 = vrot.slane %v2369_v5, 5  ;;  %v1165_v13 = vpack.c.b16 %v1159_v61, %v1158_v54  ;;  %v2094_v55 = vld [vmem:[%s2323_s25 + $0x10] sm:$0xf]  ;;  %v2050_v2 = vld [vmem:[%s2323_s25 + $0x38] sm:$0xe] }
  0x41   : > { %1990 = vmatmul.msk.bf16.vlgmr.msrb.gmra.mxu2 %vm586_vm2, %v765_v11  ;;  %v961_v11 = vsel %vm2351_vm4, %v956_v59, %v960_v56  ;;  %v750_v14 = vsel %vm2429_vm7, %v1987_v27, %v749_v6  ;;  %v979_v62 = vrot.slane %v977_v0, 4  ;;  %v982_v32 = vrot.slane %v980_v1, 5  ;;  %v2051_v27 = vld [vmem:[%s2323_s25 + $0x40] sm:$0xe] }
  0x42   : > { %v754_v5 = vsel %vm2429_vm7, %v1988_v7, %v753_v10  ;;  %v763_v19 = vunpack.c.l.b16 %v750_v14  ;;  %v993_v21 = vrot.slane %v991_v3, 4  ;;  %v996_v22 = vrot.slane %v994_v4, 5  ;;  %v2038_v10 = vld [vmem:[%s2323_s25 + $0x44] sm:$0x1] }
  0x43   : > { %v764_v24 = vunpack.c.l.b16 %v754_v5  ;;  %v1036_v25 = vunpack.c.l.b16 %v961_v11  ;;  %v766_v29 = vpack.c.b16 %v760_v9, %v759_v8  ;;  %v986_v34 = vshll.u32 %v2032_v15, 16  ;;  %v2017_v8 = vld [vmem:[%s2323_s25 + $0x38] sm:$0xf]  ;;  %v2036_v9 = vld [vmem:[%s2323_s25 + $0x3c] sm:$0x1] }
  0x44   : > { %2040 = vmatmul.msk.bf16.vlgmr.msrb.gmra.mxu0 %vm586_vm2, %v1042_v45  ;;  %2020 = vmatmul.msk.bf16.gmra.mxu3 %vm586_vm2, %v2010_v12  ;;  %v975_v12 = vsel %vm2351_vm4, %v970_v60, %v974_v57  ;;  %v2056_v35 = vrot.slane %v2048_v16, 9  ;;  %v983_v37 = vor.u32 %v982_v32, %v979_v62  ;;  %v1140_v38 = vrot.slane %v2032_v15, 5  ;;  %v2165_v15 = vld [vmem:[%s2323_s25 + $0x3c] sm:$0xf0] }
  0x45   : > { %v1037_v26 = vunpack.c.l.b16 %v975_v12  ;;  %v2507_v36 = vpack.c.b16 %v764_v24, %v763_v19  ;;  %v2057_v40 = vrot.slane %v2049_v23, 9  ;;  %v1144_v41 = vrot.slane %v2034_v28, 5  ;;  %v2532_v19 = vld [vmem:[%s2323_s25 + $0x14] sm:$0x1] }
  0x46   : > { %v997_v42 = vor.u32 %v996_v22, %v993_v21  ;;  %v1000_v17 = vshll.u32 %v2034_v28, 16  ;;  %v2014_v45 = vor.u32 %v2164_v31, %v2013_v30  ;;  %v984_v46 = vrot.slane %v983_v37, 4 }
  0x47   : > { %v1043_v44 = vpack.c.b16 %v1037_v26, %v1036_v25  ;;  %v988_v47 = vrot.slane %v986_v34, 5  ;;  %v1141_v48 = vsel %vm2429_vm7, %v2056_v35, %v1140_v38  ;;  %v1145_v49 = vsel %vm2429_vm7, %v2057_v40, %v1144_v41  ;;  %v2535_v25 = vld [vmem:[%s2323_s25 + $0x1c] sm:$0x1] }
  0x48   : > { %v998_v50 = vrot.slane %v997_v42, 4  ;;  %v1002_v51 = vrot.slane %v1000_v17, 5  ;;  %v1160_v52 = vunpack.c.l.b16 %v1141_v48  ;;  %v1161_v53 = vunpack.c.l.b16 %v1145_v49  ;;  %v2098_v49 = vld [vmem:[%s2323_s25 + $0x20] sm:$0xf] }
  0x49   : > { %v989_v56 = vsel %vm2351_vm4, %v984_v46, %v988_v47  ;;  %v1005_v57 = vshrl.u32 %v2035_v18, 16  ;;  %v1008_v60 = vshll.u32 %v2035_v18, 16  ;;  %v1019_v54 = vshrl.u32 %v2037_v20, 16 }
  0x4a   : > { %v1003_v59 = vsel %vm2351_vm4, %v998_v50, %v1002_v51  ;;  %v1022_v61 = vshll.u32 %v2037_v20, 16  ;;  %v1320_v63 = vshrl.u32 %v2094_v55, 16  ;;  %v1323_v0 = vshll.u32 %v2094_v55, 16 }
  0x4b   : > { %v1166_v1 = vpack.c.b16 %v1161_v53, %v1160_v52  ;;  %v1334_v3 = vshrl.u32 %v2096_v58, 16  ;;  %v1337_v4 = vshll.u32 %v2096_v58, 16  ;;  %v1038_v6 = vunpack.c.l.b16 %v989_v56 }
  0x4c   : > { %2062 = vmatmul.msk.bf16.gmra.mxu1 %vm586_vm2, %v1165_v13  ;;  %v1039_v7 = vunpack.c.l.b16 %v1003_v59  ;;  %v1007_v11 = vrot.slane %v1005_v57, 4  ;;  %v1010_v12 = vrot.slane %v1008_v60, 5  ;;  %v1021_v13 = vrot.slane %v1019_v54, 4 }
  0x4d   : > { %v1024_v14 = vrot.slane %v1022_v61, 5  ;;  %v2058_v62 = vrot.slane %v2050_v2, 9  ;;  %v1148_v32 = vrot.slane %v2036_v9, 5  ;;  %v2059_v16 = vrot.slane %v2051_v27, 9 }
  0x4e   : > { %v1152_v5 = vrot.slane %v2038_v10, 5  ;;  %v1322_v21 = vrot.slane %v1320_v63, 4  ;;  %v1325_v22 = vrot.slane %v1323_v0, 5  ;;  %v1336_v23 = vrot.slane %v1334_v3, 4 }
  0x4f   : > { %v1339_v24 = vrot.slane %v1337_v4, 5  ;;  %v1044_v26 = vpack.c.b16 %v1039_v7, %v1038_v6  ;;  %v2018_v28 = vor.u32 %v2165_v15, %v2017_v8  ;;  %v1028_v30 = vshll.u32 %v2038_v10, 16  ;;  %v2559_v6 = vld [vmem:[%s2323_s25 + $0x24] sm:$0x1]  ;;  %v2562_v7 = vld [vmem:[%s2323_s25 + $0x2c] sm:$0x1] }
  0x50   : > { %v1011_v31 = vor.u32 %v1010_v12, %v1007_v11  ;;  %v1025_v34 = vor.u32 %v1024_v14, %v1021_v13  ;;  %v1149_v35 = vsel %vm2429_vm7, %v2058_v62, %v1148_v32  ;;  %v1329_v37 = vshll.u32 %v2532_v19, 16  ;;  %v2115_v8 = vld [vmem:[%s2323_s25 + $0x10] sm:$0xe] }
  0x51   : > { %1991 = vmatmul.msk.bf16.gmra.mxu2 %vm586_vm2, %v766_v29  ;;  %v1014_v29 = vshll.u32 %v2036_v9, 16  ;;  %v1153_v38 = vsel %vm2429_vm7, %v2059_v16, %v1152_v5  ;;  %v1326_v40 = vor.u32 %v1325_v22, %v1322_v21  ;;  %v1340_v41 = vor.u32 %v1339_v24, %v1336_v23  ;;  %v2116_v9 = vld [vmem:[%s2323_s25 + $0x18] sm:$0xe] }
  0x52   : > { %v1343_v42 = vshll.u32 %v2535_v25, 16  ;;  %v1026_v46 = vrot.slane %v1025_v34, 4  ;;  %v1162_v47 = vunpack.c.l.b16 %v1149_v35  ;;  %v1163_v48 = vunpack.c.l.b16 %v1153_v38  ;;  %v2076_v38 = vld [vmem:[%s2323_s25 + $0x10] sm:$0xf] }
  0x53   : > { %v1016_v17 = vrot.slane %v1014_v29, 5  ;;  %v1327_v50 = vrot.slane %v1326_v40, 4  ;;  %v1331_v51 = vrot.slane %v1329_v37, 5  ;;  %v1341_v18 = vrot.slane %v1340_v41, 4  ;;  %v2170_v37 = vld [vmem:[%s2585_s19] sm:$0xff] }
  0x54   : > { %2041 = vmatmul.msk.bf16.gmra.mxu0 %vm586_vm2, %v1043_v44  ;;  %2021 = vmatmul.msk.bf16.gmra.mxu3 %vm586_vm2, %v2014_v45  ;;  %v1030_v44 = vrot.slane %v1028_v30, 5  ;;  %v1012_v45 = vrot.slane %v1011_v31, 4  ;;  %v1345_v20 = vrot.slane %v1343_v42, 5  ;;  %v1348_v52 = vshrl.u32 %v2098_v49, 16  ;;  %v2166_v40 = vld [vmem:[%s2323_s25 + $0x14] sm:$0xf0] }
  0x55   : > { %v1351_v53 = vshll.u32 %v2098_v49, 16  ;;  %v1167_v59 = vpack.c.b16 %v1163_v48, %v1162_v47  ;;  %v1332_v60 = vsel %vm2351_vm4, %v1327_v50, %v1331_v51  ;;  %v1357_v11 = vshll.u32 %v2559_v6, 16  ;;  %v2603_v50 = vld [vmem:[%s2323_s25 + $0x3c] sm:$0x1] }
  0x56   : > { %v1017_v57 = vsel %vm2351_vm4, %v1012_v45, %v1016_v17  ;;  %v1031_v58 = vsel %vm2351_vm4, %v1026_v46, %v1030_v44  ;;  %v1346_v54 = vsel %vm2351_vm4, %v1341_v18, %v1345_v20  ;;  %v1350_v61 = vrot.slane %v1348_v52, 4  ;;  %v2117_v20 = vld [vmem:[%s2323_s25 + $0x20] sm:$0xe]  ;;  %v2118_v52 = vld [vmem:[%s2323_s25 + $0x28] sm:$0xe] }
  0x57   : > { %v1353_v63 = vrot.slane %v1351_v53, 5  ;;  %v1040_v2 = vunpack.c.l.b16 %v1017_v57  ;;  %v1041_v27 = vunpack.c.l.b16 %v1031_v58  ;;  %v1433_v3 = vunpack.c.l.b16 %v1332_v60 }
  0x58   : > { %v1434_v4 = vunpack.c.l.b16 %v1346_v54  ;;  %v1371_v13 = vshll.u32 %v2562_v7, 16  ;;  %v2123_v62 = vrot.slane %v2115_v8, 9  ;;  %v1523_v32 = vrot.slane %v2532_v19, 5 }
  0x59   : > { %v1354_v10 = vor.u32 %v1353_v63, %v1350_v61  ;;  %v1045_v14 = vpack.c.b16 %v1041_v27, %v1040_v2  ;;  %v2124_v16 = vrot.slane %v2116_v9, 9  ;;  %v1527_v5 = vrot.slane %v2535_v25, 5  ;;  %v2106_v2 = vld [vmem:[%s2323_s25 + $0x40] sm:$0xf]  ;;  %v2108_v27 = vld [vmem:[%s2323_s25 + $0x48] sm:$0xf] }
  0x5a   : > { %v1441_v15 = vpack.c.b16 %v1434_v4, %v1433_v3  ;;  %v1359_v22 = vrot.slane %v1357_v11, 5  ;;  %v1373_v24 = vrot.slane %v1371_v13, 5  ;;  %vm1672_vm9 = vcmask 31744   ;;  %v2080_v3 = vld [vmem:[%s2323_s25 + $0x20] sm:$0xf] }
  0x5b   : > { %v1355_v21 = vrot.slane %v1354_v10, 4  ;;  %v1528_v19 = vsel %vm2429_vm7, %v2124_v16, %v1527_v5  ;;  %v2077_v49 = vor.u32 %v2166_v40, %v2076_v38  ;;  %v1399_v57 = vshll.u32 %v2603_v50, 16  ;;  %v2167_v4 = vld [vmem:[%s2323_s25 + $0x24] sm:$0xf0] }
  0x5c   : > { %2063 = vmatmul.msk.bf16.gmra.mxu1 %vm586_vm2, %v1166_v1  ;;  %v1556_v42 = vunpack.c.l.b16 %v1528_v19  ;;  %v2125_v58 = vrot.slane %v2117_v20, 9  ;;  %v2126_v60 = vrot.slane %v2118_v52, 9  ;;  %v1535_v54 = vrot.slane %v2562_v7, 5  ;;  %v2171_v10 = vld [vmem:[%s2585_s19 + $0x8] sm:$0xff]  ;;  %v2168_v20 = vld [vmem:[%s2323_s25 + $0x34] sm:$0xf0] }
  0x5d   : > { %v1360_v25 = vsel %vm2351_vm4, %v1355_v21, %v1359_v22  ;;  %v1404_v11 = vshrl.u32 %v2106_v2, 16  ;;  %v1418_v13 = vshrl.u32 %v2108_v27, 16  ;;  %vm1766_vm10 = vcmask 60416  }
  0x5e   : > { %v1435_v17 = vunpack.c.l.b16 %v1360_v25  ;;  %v2119_v25 = vld [vmem:[%s2323_s25 + $0x30] sm:$0xe] }
  0x5f   : > { %v1406_v21 = vrot.slane %v1404_v11, 4  ;;  %v2173_v11 = vld [vmem:[%s2585_s19 + $0x18] sm:$0xff] }
  0x61   : > { %1992 = vmatmul.msk.bf16.gmra.mxu2 %vm586_vm2, %v2478_v33  ;;  %v2100_v33 = vld [vmem:[%s2323_s25 + $0x28] sm:$0xf] }
  0x62   : > { %v1362_v55 = vshrl.u32 %v2100_v33, 16  ;;  %v1365_v56 = vshll.u32 %v2100_v33, 16  ;;  %v2600_v33 = vld [vmem:[%s2323_s25 + $0x34] sm:$0x1] }
  0x63   : > { %v1539_v38 = vrot.slane %v2600_v33, 5 }
  0x64   : > { %2042 = vmatmul.msk.bf16.gmra.mxu0 %vm586_vm2, %v1044_v26  ;;  %2022 = vmatmul.msk.bf16.gmra.mxu3 %vm586_vm2, %v2018_v28  ;;  %v1364_v0 = vrot.slane %v1362_v55, 4  ;;  %v1367_v1 = vrot.slane %v1365_v56, 5  ;;  %v2102_v26 = vld [vmem:[%s2323_s25 + $0x30] sm:$0xf]  ;;  %v2104_v28 = vld [vmem:[%s2323_s25 + $0x38] sm:$0xf] }
  0x65   : > { %v1376_v30 = vshrl.u32 %v2102_v26, 16  ;;  %v1379_v31 = vshll.u32 %v2102_v26, 16  ;;  %v1390_v34 = vshrl.u32 %v2104_v28, 16  ;;  %v1393_v35 = vshll.u32 %v2104_v28, 16  ;;  %v2107_v26 = vld [vmem:[%s2323_s25 + $0x44] sm:$0x1] }
  0x66   : > { %v1368_v12 = vor.u32 %v1367_v1, %v1364_v0  ;;  %v1385_v55 = vshll.u32 %v2600_v33, 16  ;;  %v1401_v1 = vrot.slane %v1399_v57, 5  ;;  %v2109_v28 = vld [vmem:[%s2323_s25 + $0x4c] sm:$0x1] }
  0x67   : > { %v1378_v45 = vrot.slane %v1376_v30, 4  ;;  %v1381_v46 = vrot.slane %v1379_v31, 5  ;;  %v1392_v47 = vrot.slane %v1390_v34, 4  ;;  %v1395_v48 = vrot.slane %v1393_v35, 5 }
  0x68   : > { %v1369_v23 = vrot.slane %v1368_v12, 4  ;;  %v1387_v63 = vrot.slane %v1385_v55, 5  ;;  %v1407_v12 = vshll.u32 %v2106_v2, 16  ;;  %v1413_v31 = vshll.u32 %v2107_v26, 16 }
  0x69   : > { %v1382_v53 = vor.u32 %v1381_v46, %v1378_v45  ;;  %v1396_v56 = vor.u32 %v1395_v48, %v1392_v47  ;;  %v1427_v35 = vshll.u32 %v2109_v28, 16  ;;  %v2129_v2 = vrot.slane %v2121_v43, 9 }
  0x6a   : > { %v1374_v29 = vsel %vm2351_vm4, %v1369_v23, %v1373_v24  ;;  %v1409_v22 = vrot.slane %v1407_v12, 5  ;;  %v1420_v23 = vrot.slane %v1418_v13, 4 }
  0x6b   : > { %v1436_v44 = vunpack.c.l.b16 %v1374_v29  ;;  %v1383_v61 = vrot.slane %v1382_v53, 4  ;;  %v1397_v0 = vrot.slane %v1396_v56, 4  ;;  %v2120_v29 = vld [vmem:[%s2323_s25 + $0x38] sm:$0xe]  ;;  %v1429_v45 = vrot.slane %v1427_v35, 5 }
  0x6c   : > { %2064 = vmatmul.msk.bf16.gmra.mxu1 %vm586_vm2, %v1167_v59  ;;  %v1531_v59 = vrot.slane %v2559_v6, 5  ;;  %v1536_v6 = vsel %vm2429_vm7, %v2126_v60, %v1535_v54  ;;  %v1410_v30 = vor.u32 %v1409_v22, %v1406_v21  ;;  %v2128_v40 = vrot.slane %v2120_v29, 9 }
  0x6d   : > { %v1442_v18 = vpack.c.b16 %v1436_v44, %v1435_v17  ;;  %v1388_v7 = vsel %vm2351_vm4, %v1383_v61, %v1387_v63  ;;  %v1402_v9 = vsel %vm2351_vm4, %v1397_v0, %v1401_v1  ;;  %v1415_v17 = vrot.slane %v1413_v31, 5  ;;  %v2122_v0 = vld [vmem:[%s2323_s25 + $0x48] sm:$0xe] }
  0x6e   : > { %v1532_v8 = vsel %vm2429_vm7, %v2125_v58, %v1531_v59  ;;  %v1437_v16 = vunpack.c.l.b16 %v1388_v7  ;;  %v1438_v5 = vunpack.c.l.b16 %v1402_v9 }
  0x70   : > { %v1443_v19 = vpack.c.b16 %v1438_v5, %v1437_v16 }
  0x71   : > { %1993 = vmatmul.msk.bf16.gmra.mxu2 %vm586_vm2, %v2507_v36  ;;  %v1524_v36 = vsel %vm2429_vm7, %v2123_v62, %v1523_v32  ;;  %v1557_v62 = vunpack.c.l.b16 %v1532_v8  ;;  %v1558_v32 = vunpack.c.l.b16 %v1536_v6  ;;  %v1551_v8 = vrot.slane %v2109_v28, 5 }
  0x72   : > { %v1555_v41 = vunpack.c.l.b16 %v1524_v36 }
  0x73   : > { %v1564_v36 = vpack.c.b16 %v1558_v32, %v1557_v62 }
  0x74   : > { %2043 = vmatmul.msk.bf16.gmra.mxu0 %vm586_vm2, %v1045_v14  ;;  %2111 = vmatmul.msk.bf16.vlgmr.msra.gmra.mxu3 %vm586_vm2, %v1441_v15  ;;  %v1563_v51 = vpack.c.b16 %v1556_v42, %v1555_v41  ;;  %v1421_v14 = vshll.u32 %v2108_v27, 16  ;;  %v2081_v15 = vor.u32 %v2167_v4, %v2080_v3  ;;  %v1543_v41 = vrot.slane %v2603_v50, 5 }
  0x75   : > { %v1411_v42 = vrot.slane %v1410_v30, 4  ;;  %v1547_v3 = vrot.slane %v2107_v26, 5  ;;  %v2130_v4 = vrot.slane %v2122_v0, 9 }
  0x76   : > { %v1423_v24 = vrot.slane %v1421_v14, 5  ;;  %v1544_v48 = vsel %vm2429_vm7, %v2128_v40, %v1543_v41  ;;  %v2088_v14 = vld [vmem:[%s2323_s25 + $0x40] sm:$0xf] }
  0x77   : > { %v1560_v53 = vunpack.c.l.b16 %v1544_v48  ;;  %v1548_v9 = vsel %vm2429_vm7, %v2129_v2, %v1547_v3 }
  0x78   : > { %v1424_v34 = vor.u32 %v1423_v24, %v1420_v23  ;;  %v1561_v32 = vunpack.c.l.b16 %v1548_v9 }
  0x7a   : > { %v1425_v44 = vrot.slane %v1424_v34, 4 }
  0x7c   : > { %2152 = vmatmul.msk.bf16.vlgmr.msra.gmra.mxu1 %vm1672_vm9, %v2170_v37  ;;  %v2127_v37 = vrot.slane %v2119_v25, 9  ;;  %v1430_v33 = vsel %vm2351_vm4, %v1425_v44, %v1429_v45 }
  0x7d   : > { %v1440_v56 = vunpack.c.l.b16 %v1430_v33 }
  0x7e   : > { %v1540_v47 = vsel %vm2429_vm7, %v2127_v37, %v1539_v38 }
  0x7f   : > { %v1559_v52 = vunpack.c.l.b16 %v1540_v47 }
  0x81   : > { %2090 = vmatmul.msk.bf16.vlgmr.msra.gmra.mxu2 %vm586_vm2, %v2077_v49  ;;  %v2172_v49 = vld [vmem:[%s2585_s19 + $0x10] sm:$0xff]  ;;  %v1565_v59 = vpack.c.b16 %v1560_v53, %v1559_v52 }
  0x84   : > { %2132 = vmatmul.msk.bf16.vlgmr.msra.gmra.mxu0 %vm586_vm2, %v1563_v51  ;;  %2112 = vmatmul.msk.bf16.gmra.mxu3 %vm586_vm2, %v1442_v18  ;;  %v1416_v51 = vsel %vm2351_vm4, %v1411_v42, %v1415_v17  ;;  %v2084_v18 = vld [vmem:[%s2323_s25 + $0x30] sm:$0xf] }
  0x85   : > { %v1439_v55 = vunpack.c.l.b16 %v1416_v51  ;;  %v2085_v57 = vor.u32 %v2168_v20, %v2084_v18 }
  0x87   : > { %v1444_v60 = vpack.c.b16 %v1440_v56, %v1439_v55 }
  0x8c   : > { %2153 = vmatmul.msk.bf16.gmra.mxu1 %vm1672_vm9, %v2171_v10  ;;  %v1552_v10 = vsel %vm2429_vm7, %v2130_v4, %v1551_v8 }
  0x8d   : > { %v1562_v16 = vunpack.c.l.b16 %v1552_v10 }
  0x8f   : > { %v1566_v23 = vpack.c.b16 %v1562_v16, %v1561_v32 }
  0x91   : > { %2091 = vmatmul.msk.bf16.gmra.mxu2 %vm586_vm2, %v2081_v15  ;;  %v2169_v15 = vld [vmem:[%s2323_s25 + $0x44] sm:$0xf0] }
  0x92   : > { %v2089_v21 = vor.u32 %v2169_v15, %v2088_v14 }
  0x94   : > { %2133 = vmatmul.msk.bf16.gmra.mxu0 %vm586_vm2, %v1564_v36  ;;  %2113 = vmatmul.msk.bf16.gmra.mxu3 %vm586_vm2, %v1443_v19 }
  0x97   : > { %v686_v46 = vpop.f32.mrf.mxu3 }
  0x99   : > { %v676_v50 = vpop.f32.mrf.mxu1 }
  0x9c   : > { %2154 = vmatmul.msk.bf16.gmra.mxu1 %vm1672_vm9, %v2172_v49 }
  0x9f   : > { %v688_v58 = vpop.f32.mrf.mxu3 }
  0xa1   : > { %v612_v54 = vpop.f32.mrf.mxu0  ;;  %2092 = vmatmul.msk.bf16.gmra.mxu2 %vm586_vm2, %v2085_v57  ;;  %v678_v63 = vpop.f32.mrf.mxu1 }
  0xa2   : > { %v2651_v61 = vadd.f32 %v676_v50, %v612_v54 }
  0xa4   : > { %2134 = vmatmul.msk.bf16.gmra.mxu0 %vm586_vm2, %v1565_v59  ;;  %v622_v1 = vpop.f32.mrf.mxu2  ;;  %2114 = vmatmul.msk.bf16.gmra.mxu3 %vm586_vm2, %v1444_v60 }
  0xa5   : > { %v2656_v27 = vadd.f32 %v686_v46, %v622_v1 }
  0xa7   : > { %v691_v6 = vpop.f32.mrf.mxu3 }
  0xa9   : > { %v614_v7 = vpop.f32.mrf.mxu0  ;;  %v681_v13 = vpop.f32.mrf.mxu1 }
  0xaa   : > { %v679_v12 = vadd.f32 %v678_v63, %v614_v7 }
  0xac   : > { %v624_v62 = vpop.f32.mrf.mxu2  ;;  %2155 = vmatmul.msk.bf16.gmra.mxu1 %vm1672_vm9, %v2173_v11 }
  0xad   : > { %v2665_v5 = vadd.f32 %v688_v58, %v624_v62 }
  0xaf   : > { %v693_v22 = vpop.f32.mrf.mxu3 }
  0xb1   : > { %v617_v24 = vpop.f32.mrf.mxu0  ;;  %2093 = vmatmul.msk.bf16.gmra.mxu2 %vm586_vm2, %v2089_v21  ;;  %v683_v26 = vpop.f32.mrf.mxu1  ;;  %v2721_v21 = vld [vmem:[%s2826_s6] ss:$0 sm:$0xff] }
  0xb2   : > { %v682_v39 = vadd.f32 %v681_v13, %v617_v24 }
  0xb4   : > { %2135 = vmatmul.msk.bf16.gmra.mxu0 %vm586_vm2, %v1566_v23  ;;  %v627_v28 = vpop.f32.mrf.mxu2 }
  0xb5   : > { %v2670_v36 = vadd.f32 %v691_v6, %v627_v28 }
  0xb7   : > { %v876_v19 = vpop.f32.mrf.mxu3 }
  0xb9   : > { %v619_v25 = vpop.f32.mrf.mxu0  ;;  %v1192_v30 = vpop.f32.mrf.mxu1 }
  0xba   : > { %v2672_v29 = vadd.f32 %v683_v26, %v619_v25 }
  0xbc   : > { %v629_v31 = vpop.f32.mrf.mxu2 }
  0xbd   : > { %v2674_v34 = vadd.f32 %v693_v22, %v629_v31  ;;  %v2726_v22 = vld [vmem:[%s2823_s3] ss:$0 sm:$0xff] }
  0xbe   : > { %v2734_v31 = vld [vmem:[%s2827_s7] ss:$0 sm:$0xff] }
  0xbf   : > { %v878_v35 = vpop.f32.mrf.mxu3 }
  0xc1   : > { %v1070_v37 = vpop.f32.mrf.mxu0  ;;  %v1194_v38 = vpop.f32.mrf.mxu1 }
  0xc4   : > { %v793_v40 = vpop.f32.mrf.mxu2 }
  0xc5   : > { %v813_v63 = vadd.f32 %v793_v40, %v2651_v61  ;;  %v2716_v61 = vld [vmem:[%s2822_s2] ss:$0 sm:$0xff] }
  0xc7   : > { %v881_v41 = vpop.f32.mrf.mxu3  ;;  %v896_v2 = vadd.f32 %v876_v19, %v813_v63 }
  0xc9   : > { %v1072_v42 = vpop.f32.mrf.mxu0  ;;  %v2676_v17 = vpop.f32.mrf.mxu1  ;;  %v1090_v8 = vadd.f32 %v1070_v37, %v896_v2 }
  0xcb   : > { %v1212_v10 = vadd.f32 %v1192_v30, %v1090_v8 }
  0xcc   : > { %v795_v44 = vpop.f32.mrf.mxu2 }
  0xcd   : > { %v814_v6 = vadd.f32 %v795_v44, %v679_v12 }
  0xcf   : > { %v883_v45 = vpop.f32.mrf.mxu3  ;;  %v897_v11 = vadd.f32 %v878_v35, %v814_v6 }
  0xd1   : > { %v1075_v46 = vpop.f32.mrf.mxu0  ;;  %v2678_v47 = vpop.f32.mrf.mxu1  ;;  %v1091_v62 = vadd.f32 %v1072_v42, %v897_v11 }
  0xd3   : > { %v1213_v24 = vadd.f32 %v1194_v38, %v1091_v62 }
  0xd4   : > { %v798_v48 = vpop.f32.mrf.mxu2 }
  0xd5   : > { %v815_v32 = vadd.f32 %v798_v48, %v682_v39 }
  0xd7   : > { %v2680_v49 = vpop.f32.mrf.mxu3  ;;  %v898_v39 = vadd.f32 %v881_v41, %v815_v32 }
  0xd9   : > { %v2682_v51 = vpop.f32.mrf.mxu0  ;;  %v2684_v33 = vpop.f32.mrf.mxu1  ;;  %v1092_v40 = vadd.f32 %v1075_v46, %v898_v39 }
  0xdb   : > { %v1214_v2 = vadd.f32 %v2676_v17, %v1092_v40 }
  0xdc   : > { %v800_v50 = vpop.f32.mrf.mxu2 }
  0xdd   : > { %v816_v37 = vadd.f32 %v800_v50, %v2672_v29 }
  0xdf   : > { %v2686_v18 = vpop.f32.mrf.mxu3 }
  0xe1   : > { %v2688_v20 = vpop.f32.mrf.mxu0  ;;  %v2690_v52 = vpop.f32.mrf.mxu1 }
  0xe4   : > { %v803_v53 = vpop.f32.mrf.mxu2 }
  0xe7   : > { %v2692_v55 = vpop.f32.mrf.mxu3 }
  0xe9   : > { %v2694_v56 = vpop.f32.mrf.mxu0  ;;  %v2696_v57 = vpop.f32.mrf.mxu1 }
  0xec   : > { %v2698_v58 = vpop.f32.mrf.mxu2 }
  0xef   : > { %v2700_v59 = vpop.f32.mrf.mxu3 }
  0xf1   : > { %v2702_v60 = vpop.f32.mrf.mxu0  ;;  %v2704_v54 = vpop.f32.mrf.mxu1 }
  0xf4   : > { %v2706_v43 = vpop.f32.mrf.mxu2 }
  0xf7   : > { %v1469_v0 = vpop.f32.mrf.mxu3 }
  0xf9   : > { %v2709_v1 = vpop.f32.mrf.mxu0  ;;  %v1698_v4 = vpop.f32.mrf.mxu1 }
  0xfa   : > { %v1722_v28 = vmul.f32 %v2721_v21, %v1698_v4 }
  0xfc   : > { %v2711_v3 = vpop.f32.mrf.mxu2 }
  0xff   : > { %v1471_v9 = vpop.f32.mrf.mxu3 }
 0x101   : > { %v1591_v7 = vpop.f32.mrf.mxu0  ;;  %v1700_v15 = vpop.f32.mrf.mxu1 }
 0x102   : > { %v1723_v6 = vmul.f32 %v2721_v21, %v1700_v15 }
 0x104   : > { %v1275_v13 = vpop.f32.mrf.mxu2 }
 0x105   : > { %v1295_v14 = vadd.f32 %v1275_v13, %v1212_v10 }
 0x107   : > { %v1489_v16 = vadd.f32 %v1469_v0, %v1295_v14  ;;  %v1474_v25 = vpop.f32.mrf.mxu3  ;;  %v899_v0 = vadd.f32 %v883_v45, %v816_v37 }
 0x109   : > { %v1611_v12 = vadd.f32 %v1591_v7, %v1489_v16  ;;  %v1593_v23 = vpop.f32.mrf.mxu0  ;;  %v1703_v42 = vpop.f32.mrf.mxu1  ;;  %v1093_v17 = vadd.f32 %v2682_v51, %v899_v0  ;;  %v819_v0 = vadd.f32 %v2706_v43, %v2670_v36 }
 0x10b   : > { %v1623_v26 = vmul.f32 %v2716_v61, %v1611_v12  ;;  %v1215_v32 = vadd.f32 %v2678_v47, %v1093_v17 }
 0x10c   : > { %v1277_v19 = vpop.f32.mrf.mxu2 }
 0x10d   : > { %v1635_v30 = vadd.f32 %v2726_v22, %v1623_v26  ;;  %v1296_v35 = vadd.f32 %v1277_v19, %v1213_v24  ;;  %v818_v26 = vadd.f32 %v2698_v58, %v2665_v5 }
 0x10f   : > { %v1730_v38 = vadd.f32 %v1722_v28, %v1635_v30  ;;  %v1490_v41 = vadd.f32 %v1471_v9, %v1296_v35  ;;  %v1476_v7 = vpop.f32.mrf.mxu3  ;;  %v817_v9 = vadd.f32 %v803_v53, %v2656_v27  ;;  %v901_v35 = vadd.f32 %v2686_v18, %v818_v26 }
 0x111   : > { %v1742_v44 = vadd.f32 %v2734_v31, %v1730_v38  ;;  %v1612_v48 = vadd.f32 %v1593_v23, %v1490_v41  ;;  %v1596_v63 = vpop.f32.mrf.mxu0  ;;  %v1705_v16 = vpop.f32.mrf.mxu1  ;;  %v900_v15 = vadd.f32 %v2680_v49, %v817_v9  ;;  %v1724_v23 = vmul.f32 %v2721_v21, %v1703_v42 }
 0x113   : > { %v1750_v4 = vmax.f32 %v1742_v44, 0.0  ;;  %v1624_v8 = vmul.f32 %v2716_v61, %v1612_v48  ;;  %v1094_v28 = vadd.f32 %v2688_v20, %v900_v15  ;;  %v1725_v44 = vmul.f32 %v2721_v21, %v1705_v16 }
 0x114   : > { %v1280_v29 = vpop.f32.mrf.mxu2 }
 0x115   : > { %v1758_v46 = vpack.c.bf16 %v1750_v4, %v1750_v4  ;;  %v1636_v50 = vadd.f32 %v2726_v22, %v1624_v8  ;;  %v1297_v45 = vadd.f32 %v1280_v29, %v1214_v2  ;;  %v1216_v40 = vadd.f32 %v2684_v33, %v1094_v28 }
 0x117   : > { %1767 = vst.msk [vmem:[%s2745_s12] sm:$0xf] %vm1766_vm10, %v1758_v46  ;;  %v1731_v10 = vadd.f32 %v1723_v6, %v1636_v50  ;;  %v1491_v11 = vadd.f32 %v1474_v25, %v1297_v45  ;;  %v1479_v49 = vpop.f32.mrf.mxu3  ;;  %v902_v46 = vadd.f32 %v2692_v55, %v819_v0 }
 0x119   : > { %v1743_v13 = vadd.f32 %v2734_v31, %v1731_v10  ;;  %v1613_v14 = vadd.f32 %v1596_v63, %v1491_v11  ;;  %v1598_v62 = vpop.f32.mrf.mxu0  ;;  %v1708_v58 = vpop.f32.mrf.mxu1  ;;  %v1095_v63 = vadd.f32 %v2694_v56, %v901_v35  ;;  %v1096_v10 = vadd.f32 %v2702_v60, %v902_v46 }
 0x11a   : > { %v1726_v56 = vmul.f32 %v2721_v21, %v1708_v58 }
 0x11b   : > { %v1751_v12 = vmax.f32 %v1743_v13, 0.0  ;;  %v1625_v51 = vmul.f32 %v2716_v61, %v1613_v14  ;;  %v1217_v8 = vadd.f32 %v2690_v52, %v1095_v63  ;;  %v820_v52 = vadd.f32 %v2711_v3, %v2674_v34 }
 0x11c   : > { %v1282_v27 = vpop.f32.mrf.mxu2 }
 0x11d   : > { %v1759_v53 = vpack.c.bf16 %v1751_v12, %v1751_v12  ;;  %v1637_v24 = vadd.f32 %v2726_v22, %v1625_v51  ;;  %v1298_v39 = vadd.f32 %v1282_v27, %v1215_v32  ;;  %v903_v32 = vadd.f32 %v2700_v59, %v820_v52 }
 0x11f   : > { %1768 = vst.msk [vmem:[%s2745_s12 + $0x4] sm:$0xf] %vm1766_vm10, %v1759_v53  ;;  %v1732_v47 = vadd.f32 %v1724_v23, %v1637_v24  ;;  %v1492_v19 = vadd.f32 %v1476_v7, %v1298_v39  ;;  %v1481_v29 = vpop.f32.mrf.mxu3  ;;  %v1097_v53 = vadd.f32 %v2709_v1, %v903_v32 }
 0x121   : > { %v1744_v25 = vadd.f32 %v2734_v31, %v1732_v47  ;;  %v1614_v30 = vadd.f32 %v1598_v62, %v1492_v19  ;;  %v1601_v37 = vpop.f32.mrf.mxu0  ;;  %v1710_v9 = vpop.f32.mrf.mxu1  ;;  %v1218_v62 = vadd.f32 %v2696_v57, %v1096_v10  ;;  %v1219_v28 = vadd.f32 %v2704_v54, %v1097_v53 }
 0x122   : > { %v1727_v3 = vmul.f32 %v2721_v21, %v1710_v9 }
 0x123   : > { %v1752_v38 = vmax.f32 %v1744_v25, 0.0  ;;  %v1626_v41 = vmul.f32 %v2716_v61, %v1614_v30 }
 0x124   : > { %v1285_v5 = vpop.f32.mrf.mxu2 }
 0x125   : > { %v1760_v20 = vpack.c.bf16 %v1752_v38, %v1752_v38  ;;  %v1638_v42 = vadd.f32 %v2726_v22, %v1626_v41  ;;  %v1299_v48 = vadd.f32 %v1285_v5, %v1216_v40 }
 0x127   : > { %1769 = vst.msk [vmem:[%s2745_s12 + $0x8] sm:$0xf] %vm1766_vm10, %v1760_v20  ;;  %v1733_v18 = vadd.f32 %v1725_v44, %v1638_v42  ;;  %v1493_v33 = vadd.f32 %v1479_v49, %v1299_v48  ;;  %v1484_v12 = vpop.f32.mrf.mxu3 }
 0x129   : > { %v1745_v2 = vadd.f32 %v2734_v31, %v1733_v18  ;;  %v1615_v4 = vadd.f32 %v1601_v37, %v1493_v33  ;;  %v1603_v45 = vpop.f32.mrf.mxu0  ;;  %v1713_v59 = vpop.f32.mrf.mxu1 }
 0x12a   : > { %v1728_v49 = vmul.f32 %v2721_v21, %v1713_v59 }
 0x12b   : > { %v1753_v50 = vmax.f32 %v1745_v2, 0.0  ;;  %v1627_v6 = vmul.f32 %v2716_v61, %v1615_v4 }
 0x12c   : > { %v1287_v36 = vpop.f32.mrf.mxu2 }
 0x12d   : > { %v1761_v43 = vpack.c.bf16 %v1753_v50, %v1753_v50  ;;  %v1639_v17 = vadd.f32 %v2726_v22, %v1627_v6  ;;  %v1300_v7 = vadd.f32 %v1287_v36, %v1217_v8 }
 0x12f   : > { %1770 = vst.msk [vmem:[%s2745_s12 + $0xc] sm:$0xf] %vm1766_vm10, %v1761_v43  ;;  %v1734_v55 = vadd.f32 %v1726_v56, %v1639_v17  ;;  %v1494_v11 = vadd.f32 %v1481_v29, %v1300_v7  ;;  %v1486_v37 = vpop.f32.mrf.mxu3 }
 0x131   : > { %v1746_v13 = vadd.f32 %v2734_v31, %v1734_v55  ;;  %v1616_v14 = vadd.f32 %v1603_v45, %v1494_v11  ;;  %v1606_v27 = vpop.f32.mrf.mxu0  ;;  %v1715_v58 = vpop.f32.mrf.mxu1 }
 0x132   : > { %v1729_v63 = vmul.f32 %v2721_v21, %v1715_v58 }
 0x133   : > { %v1754_v16 = vmax.f32 %v1746_v13, 0.0  ;;  %v1628_v15 = vmul.f32 %v2716_v61, %v1616_v14 }
 0x134   : > { %v1290_v60 = vpop.f32.mrf.mxu2 }
 0x135   : > { %v1762_v51 = vpack.c.bf16 %v1754_v16, %v1754_v16  ;;  %v1640_v34 = vadd.f32 %v2726_v22, %v1628_v15  ;;  %v1301_v23 = vadd.f32 %v1290_v60, %v1218_v62 }
 0x137   : > { %1771 = vst.msk [vmem:[%s2745_s12 + $0x10] sm:$0xf] %vm1766_vm10, %v1762_v51  ;;  %v1735_v57 = vadd.f32 %v1727_v3, %v1640_v34  ;;  %v1495_v24 = vadd.f32 %v1484_v12, %v1301_v23 }
 0x139   : > { %v1747_v39 = vadd.f32 %v2734_v31, %v1735_v57  ;;  %v1617_v26 = vadd.f32 %v1606_v27, %v1495_v24  ;;  %v1608_v41 = vpop.f32.mrf.mxu0 }
 0x13b   : > { %v1755_v47 = vmax.f32 %v1747_v39, 0.0  ;;  %v1629_v19 = vmul.f32 %v2716_v61, %v1617_v26 }
 0x13c   : > { %v1292_v25 = vpop.f32.mrf.mxu2 }
 0x13d   : > { %v1763_v30 = vpack.c.bf16 %v1755_v47, %v1755_v47  ;;  %v1641_v1 = vadd.f32 %v2726_v22, %v1629_v19  ;;  %v1302_v35 = vadd.f32 %v1292_v25, %v1219_v28 }
 0x13f   : > { %1772 = vst.msk [vmem:[%s2745_s12 + $0x14] sm:$0xf] %vm1766_vm10, %v1763_v30  ;;  %v1736_v40 = vadd.f32 %v1728_v49, %v1641_v1  ;;  %v1496_v38 = vadd.f32 %v1486_v37, %v1302_v35 }
 0x141   : > { %v1748_v54 = vadd.f32 %v2734_v31, %v1736_v40  ;;  %v1618_v5 = vadd.f32 %v1608_v41, %v1496_v38 }
 0x143   : > { %v1756_v20 = vmax.f32 %v1748_v54, 0.0  ;;  %v1630_v42 = vmul.f32 %v2716_v61, %v1618_v5 }
 0x145   : > { %v1764_v44 = vpack.c.bf16 %v1756_v20, %v1756_v20  ;;  %v1642_v48 = vadd.f32 %v2726_v22, %v1630_v42 }
 0x147   : > { %1773 = vst.msk [vmem:[%s2745_s12 + $0x18] sm:$0xf] %vm1766_vm10, %v1764_v44  ;;  %v1737_v0 = vadd.f32 %v1729_v63, %v1642_v48 }
 0x149   : > { %v1749_v18 = vadd.f32 %v2734_v31, %v1737_v0 }
 0x14b   : > { %v1757_v33 = vmax.f32 %v1749_v18, 0.0 }
 0x14d   : > { %v1765_v2 = vpack.c.bf16 %v1757_v33, %v1757_v33 }
 0x14f   : > { %1774 = vst.msk [vmem:[%s2745_s12 + $0x1c] sm:$0xf] %vm1766_vm10, %v1765_v2 }
 0x150 PF: > { %s18_s29 = sadd.s32 1, %s2227_s29   ;;  %s2833_s27 = smov %s2223_s28 }
 0x151   : > { %p15_p6 = scmp.ge.s32.totalorder %s18_s29, 4   ;;  %s2834_s28 = smov %s2836_s30 }
 0x153   :  { %17 = sbr.rel (!%p15_p6) target bundleno = 2 (0x2), region = 113 }

</bundles_post_ra>
